<compile_context>
chip_gen: v6e
topology: v6e:2x2x1
jax: 0.10.0
libtpu: 0.0.40
codegen_flags: <defaults>
</compile_context>

<pallas_src>
import jax
import jax.numpy as jnp
from jax.experimental import pallas as pl
from jax.experimental.pallas import tpu as pltpu

EPS = 1e-5


def _round_up(x, m):
    return (x + m - 1) // m * m


def _pick_tiles(mo):
    """Pick (TM, grid_m).  Prefer an exact 2-way split (even megacore split on
    v7x, only one extra ~0.35us step on single-TC chips); otherwise one step
    for small M; otherwise fixed 256-row tiles."""
    half = mo // 2
    if mo % 2 == 0 and half % 8 == 0 and half <= 512:
        return half, 2
    if mo <= 1024:
        return _round_up(mo, 8), 1
    return 256, (mo + 255) // 256


# ----------------------------- Pallas kernel --------------------------------

def _conv_bn_pool_relu_kernel(p_ref, w_ref, b_ref, o_ref, acc_ref):
    # p_ref : (1, 4*TM, K) bf16  -- the four pool-corner patch tiles stacked
    #                               along rows (corner-major, TM rows each).
    # w_ref : (K, OCP) bf16      -- conv weight with BN scale folded in.
    # b_ref : (1, OCP) f32       -- folded conv-bias + BN shift.
    # o_ref : (TM, OCP)          -- pooled, ReLU'd output tile.
    # acc_ref: (4*TM, OCP) f32 VMEM scratch for the matmul result.
    tm = o_ref.shape[0]

    # Single MXU matmul for all four corners: weight pushed once per step.
    acc_ref[...] = jnp.dot(p_ref[0], w_ref[...],
                           preferred_element_type=jnp.float32)

    # 2x2 max-pool as a running max over the four corner row-slices
    # (keeps at most two (TM, OCP) f32 values live), then bias + ReLU.
    m = jnp.maximum(acc_ref[0 * tm:1 * tm, :], acc_ref[1 * tm:2 * tm, :])
    m = jnp.maximum(m, acc_ref[2 * tm:3 * tm, :])
    m = jnp.maximum(m, acc_ref[3 * tm:4 * tm, :])
    o_ref[...] = jnp.maximum(m + b_ref[...], 0.0).astype(o_ref.dtype)


def conv_bn_pool_relu(corners, w_mat, scale, bias, out_dtype):
    """corners: 4 x (Mo, K) patch matrices (one per 2x2 pool corner);
       w_mat: (K, OC) f32; scale/bias: (OC,) f32.  Returns (Mo, OC) out_dtype."""
    mo, k = corners[0].shape
    oc = w_mat.shape[1]
    ocp = _round_up(oc, 128)                 # lane-dense output channels
    tm, grid_m = _pick_tiles(mo)
    mp = tm * grid_m

    # LHS: pad M only if needed, stack the 4 corners corner-major per M-tile:
    # (grid_m, 4*TM, K).  K is left unpadded (full-extent block is legal).
    def pad_m(c):
        return jnp.pad(c, ((0, mp - mo), (0, 0))) if mp > mo else c

    lhs = jnp.stack([pad_m(c) for c in corners], axis=0)        # (4, MP, K)
    lhs = (lhs.reshape(4, grid_m, tm, k).transpose(1, 0, 2, 3)
              .reshape(grid_m, 4 * tm, k).astype(jnp.bfloat16))

    # RHS: fold BN scale into the weight in f32, then pad OC and cast bf16.
    w_scaled = w_mat * scale[None, :]                           # f32
    wp = jnp.pad(w_scaled, ((0, 0), (0, ocp - oc))).astype(jnp.bfloat16)
    bp = jnp.pad(bias.reshape(1, oc).astype(jnp.float32),
                 ((0, 0), (0, ocp - oc)))

    flops = 2 * 4 * mp * k * ocp
    bytes_accessed = (4 * mp * k * 2 + k * ocp * 2 + ocp * 4
                      + mp * ocp * jnp.dtype(out_dtype).itemsize)

    out = pl.pallas_call(
        _conv_bn_pool_relu_kernel,
        out_shape=jax.ShapeDtypeStruct((mp, ocp), out_dtype),
        grid=(grid_m,),
        in_specs=[pl.BlockSpec((1, 4 * tm, k), lambda i: (i, 0, 0)),
                  pl.BlockSpec((k, ocp), lambda i: (0, 0)),
                  pl.BlockSpec((1, ocp), lambda i: (0, 0))],
        out_specs=pl.BlockSpec((tm, ocp), lambda i: (i, 0)),
        scratch_shapes=[pltpu.VMEM((4 * tm, ocp), jnp.float32)],
        compiler_params=pltpu.CompilerParams(
            dimension_semantics=("parallel",)),
        cost_estimate=pl.CostEstimate(flops=flops, transcendentals=0,
                                      bytes_accessed=int(bytes_accessed)),
    )(lhs, wp, bp)
    return out[:mo, :oc]


# ------------------------------- JAX glue ------------------------------------

def _im2col_nhwc(x, kh, kw):
    """(N,H,W,C) -> (N, OH, OW, C*kh*kw); columns ordered (C major, tap minor),
       matching conv_w.reshape(OC, IC*KH*KW)."""
    n, h, w, c = x.shape
    oh, ow = h - kh + 1, w - kw + 1
    taps = [x[:, i:i + oh, j:j + ow, :] for i in range(kh) for j in range(kw)]
    p = jnp.stack(taps, axis=-1)            # (N, OH, OW, C, kh*kw)
    return p.reshape(n, oh, ow, c * kh * kw)


def _fold_bn(conv_b, gamma, beta, rmean, rvar):
    scale = gamma / jnp.sqrt(rvar + EPS)
    bias = beta + (conv_b - rmean) * scale
    return scale, bias


def _block(x_nhwc, conv_w, conv_b, gamma, beta, rmean, rvar, out_dtype):
    """Conv2d(k, VALID) + BN(eval) + MaxPool2d(2) + ReLU.  NHWC in, NHWC out."""
    oc, _, kh, kw = conv_w.shape
    patches = _im2col_nhwc(x_nhwc, kh, kw)            # (N, OH, OW, K)
    n, oh, ow, k = patches.shape
    ph, pw = oh // 2, ow // 2                         # MaxPool2d(2), floor mode
    corners = [patches[:, dy:2 * ph:2, dx:2 * pw:2, :].reshape(n * ph * pw, k)
               for dy in range(2) for dx in range(2)]
    w_mat = conv_w.reshape(oc, k).T.astype(jnp.float32)   # (K, OC)
    scale, bias = _fold_bn(conv_b, gamma, beta, rmean, rvar)
    y = conv_bn_pool_relu(corners, w_mat, scale, bias, out_dtype)
    return y.reshape(n, ph, pw, oc)


def feature_extractor_forward(x_nchw, params):
    x = x_nchw.transpose(0, 2, 3, 1)                  # NHWC end-to-end inside
    # block 1: conv1 -> bn1 -> pool1 -> relu1 (one pallas_call), bf16 out
    y = _block(x, params["w1"], params["b1"], params["g1"], params["be1"],
               params["m1"], params["v1"], jnp.bfloat16)     # (N, 12, 12, 64)
    # block 2: conv2 -> bn2 -> drop (identity in eval) -> pool2 -> relu2
    y = _block(y, params["w2"], params["b2"], params["g2"], params["be2"],
               params["m2"], params["v2"], jnp.float32)       # (N, 4, 4, 50)
    return y.transpose(0, 3, 1, 2)                    # back to NCHW


# ----------------------------- references ------------------------------------

def _ref_forward_f32(x, p):
    """PyTorch-semantics reference: f32 conv (HIGHEST), eval BN, pool, relu."""
    def conv(x, w, b):
        y = jax.lax.conv_general_dilated(
            x, w, (1, 1), "VALID",
            dimension_numbers=("NCHW", "OIHW", "NCHW"),
            precision=jax.lax.Precision.HIGHEST)
        return y + b[None, :, None, None]

    def bn(x, g, be, m, v):
        return ((x - m[None, :, None, None])
                / jnp.sqrt(v[None, :, None, None] + EPS)
                * g[None, :, None, None] + be[None, :, None, None])

    def pool(x):
        n, c, h, w = x.shape
        return x.reshape(n, c, h // 2, 2, w // 2, 2).max(axis=(3, 5))

    y = jnp.maximum(pool(bn(conv(x, p["w1"], p["b1"]),
                            p["g1"], p["be1"], p["m1"], p["v1"])), 0.0)
    y = jnp.maximum(pool(bn(conv(y, p["w2"], p["b2"]),
                            p["g2"], p["be2"], p["m2"], p["v2"])), 0.0)
    return y


def _ref_forward_matched(x, p):
    """Mirror of the kernel dataflow (bf16 MXU inputs with BN scale folded into
       the weight, f32 accumulate, pool-max then bias+ReLU, bf16 intermediate)
       in plain JAX -- validates the Pallas path with tight tolerance."""
    def block(x_nhwc, w, b, g, be, m, v, out_dtype):
        oc, _, kh, kw = w.shape
        patches = _im2col_nhwc(x_nhwc, kh, kw)
        n, oh, ow, k = patches.shape
        scale, bias = _fold_bn(b, g, be, m, v)
        w_s = (w.reshape(oc, k).T * scale[None, :]).astype(jnp.bfloat16)
        y = jnp.dot(patches.reshape(-1, k).astype(jnp.bfloat16), w_s,
                    preferred_element_type=jnp.float32).reshape(n, oh, ow, oc)
        y = y.reshape(n, oh // 2, 2, ow // 2, 2, oc).max(axis=(2, 4))
        return jnp.maximum(y + bias, 0.0).astype(out_dtype)

    y = block(x.transpose(0, 2, 3, 1), p["w1"], p["b1"], p["g1"], p["be1"],
              p["m1"], p["v1"], jnp.bfloat16)
    y = block(y, p["w2"], p["b2"], p["g2"], p["be2"],
              p["m2"], p["v2"], jnp.float32)
    return y.transpose(0, 3, 1, 2)


# --------------------------------- main ---------------------------------------

def _init_params(key):
    ks = jax.random.split(key, 12)
    f32 = jnp.float32
    return {
        "w1": jax.random.normal(ks[0], (64, 3, 5, 5), f32) * 0.1,
        "b1": jax.random.normal(ks[1], (64,), f32) * 0.1,
        "g1": 1.0 + 0.1 * jax.random.normal(ks[2], (64,), f32),
        "be1": 0.1 * jax.random.normal(ks[3], (64,), f32),
        "m1": 0.1 * jax.random.normal(ks[4], (64,), f32),
        "v1": 0.5 + jax.random.uniform(ks[5], (64,), f32),
        "w2": jax.random.normal(ks[6], (50, 64, 5, 5), f32) * 0.05,
        "b2": jax.random.normal(ks[7], (50,), f32) * 0.1,
        "g2": 1.0 + 0.1 * jax.random.normal(ks[8], (50,), f32),
        "be2": 0.1 * jax.random.normal(ks[9], (50,), f32),
        "m2": 0.1 * jax.random.normal(ks[10], (50,), f32),
        "v2": 0.5 + jax.random.uniform(ks[11], (50,), f32),
    }


if __name__ == "__main__":
    key = jax.random.PRNGKey(0)
    kx, kp = jax.random.split(key)
    # DANN-style input: 3-channel 28x28 images (28 -conv5-> 24 -pool-> 12
    # -conv5-> 8 -pool-> 4), batch = 2.
    x = jax.random.normal(kx, (2, 3, 28, 28), jnp.float32)
    params = _init_params(kp)

    fwd = jax.jit(feature_extractor_forward)
    out = jax.block_until_ready(fwd(x, params))
    assert out.shape == (2, 50, 4, 4), out.shape

    # Tight check vs. a matched-precision reference (bf16 inputs, scale folded
    # into the weight, f32 accumulation, bf16 intermediate) -- validates the
    # im2col, corner stacking, BN fold, pool max and bias/ReLU epilogue.
    ref_m = jax.block_until_ready(_ref_forward_matched(x, params))
    err_m = float(jnp.max(jnp.abs(out - ref_m)))
    assert jnp.allclose(out, ref_m, rtol=5e-3, atol=5e-3), err_m

    # Looser check vs. the full-f32 (PyTorch-semantics) reference; the gap is
    # only the bf16 quantization of the MXU inputs (f32 accumulation kept).
    ref_f = jax.block_until_ready(_ref_forward_f32(x, params))
    err_f = float(jnp.max(jnp.abs(out - ref_f)))
    assert jnp.allclose(out, ref_f, rtol=5e-2, atol=5e-2), err_f

    print("KERNEL_OK")
</pallas_src>

<mosaic_0001>
module attributes {stable_mosaic.version = 11 : i64} {
  func.func @_conv_bn_pool_relu_kernel(%arg0: i32, %arg1: memref<1x576x75xbf16, #tpu.memory_space<vmem>>, %arg2: memref<75x128xbf16, #tpu.memory_space<vmem>>, %arg3: memref<1x128xf32, #tpu.memory_space<vmem>>, %arg4: memref<144x128xbf16, #tpu.memory_space<vmem>>, %arg5: memref<576x128xf32, #tpu.memory_space<vmem>>) attributes {dimension_semantics = [#tpu.dimension_semantics<parallel>], iteration_bounds = array<i64: 2>, scalar_prefetch = 0 : i64, scratch_operands = 1 : i64, tpu.core_type = #tpu.core_type<tc>, window_params = [{transform_indices = @transform_0, window_bounds = array<i64: 1, 576, 75>}, {pipeline_mode = #tpu.pipeline_mode<synchronous>, transform_indices = @transform_1, window_bounds = array<i64: 75, 128>}, {pipeline_mode = #tpu.pipeline_mode<synchronous>, transform_indices = @transform_2, window_bounds = array<i64: 1, 128>}, {transform_indices = @transform_3, window_bounds = array<i64: 144, 128>}]} {
    %c0 = arith.constant 0 : index
    %c0_0 = arith.constant 0 : index
    %c0_1 = arith.constant 0 : index
    %0 = vector.load %arg1[%c0, %c0_0, %c0_1] : memref<1x576x75xbf16, #tpu.memory_space<vmem>>, vector<1x576x75xbf16>
    %1 = vector.shape_cast %0 : vector<1x576x75xbf16> to vector<576x75xbf16>
    %c0_2 = arith.constant 0 : index
    %c0_3 = arith.constant 0 : index
    %2 = vector.load %arg2[%c0_2, %c0_3] : memref<75x128xbf16, #tpu.memory_space<vmem>>, vector<75x128xbf16>
    %cst = arith.constant dense<0.000000e+00> : vector<576x128xf32>
    %3 = tpu.matmul %1, %2, %cst {dimension_numbers = #tpu.dot_dimension_numbers<[1], [0], [0], [1], [0, 0, 1, 1], [], []>} : vector<576x75xbf16>, vector<75x128xbf16>, vector<576x128xf32> -> vector<576x128xf32>
    %c0_4 = arith.constant 0 : index
    %c0_5 = arith.constant 0 : index
    %4 = vector.load %arg5[%c0_4, %c0_5] : memref<576x128xf32, #tpu.memory_space<vmem>>, vector<576x128xf32>
    tpu.vector_store %arg5[%c0_4, %c0_5], %3 {strides = array<i32>} : memref<576x128xf32, #tpu.memory_space<vmem>>, vector<576x128xf32>,
    %c0_6 = arith.constant 0 : index
    %c0_7 = arith.constant 0 : index
    %5 = vector.load %arg5[%c0_6, %c0_7] : memref<576x128xf32, #tpu.memory_space<vmem>>, vector<144x128xf32>
    %c144 = arith.constant 144 : index
    %c0_8 = arith.constant 0 : index
    %6 = vector.load %arg5[%c144, %c0_8] : memref<576x128xf32, #tpu.memory_space<vmem>>, vector<144x128xf32>
    %7 = arith.maximumf %5, %6 : vector<144x128xf32>
    %c288 = arith.constant 288 : index
    %c0_9 = arith.constant 0 : index
    %8 = vector.load %arg5[%c288, %c0_9] : memref<576x128xf32, #tpu.memory_space<vmem>>, vector<144x128xf32>
    %9 = arith.maximumf %7, %8 : vector<144x128xf32>
    %c432 = arith.constant 432 : index
    %c0_10 = arith.constant 0 : index
    %10 = vector.load %arg5[%c432, %c0_10] : memref<576x128xf32, #tpu.memory_space<vmem>>, vector<144x128xf32>
    %11 = arith.maximumf %9, %10 : vector<144x128xf32>
    %c0_11 = arith.constant 0 : index
    %c0_12 = arith.constant 0 : index
    %12 = vector.load %arg3[%c0_11, %c0_12] : memref<1x128xf32, #tpu.memory_space<vmem>>, vector<1x128xf32>
    %13 = vector.broadcast %12 : vector<1x128xf32> to vector<144x128xf32>
    %14 = arith.addf %11, %13 : vector<144x128xf32>
    %cst_13 = arith.constant 0.000000e+00 : f32
    %15 = vector.broadcast %cst_13 : f32 to vector<144x128xf32>
    %16 = arith.maximumf %14, %15 : vector<144x128xf32>
    %17 = arith.truncf %16 : vector<144x128xf32> to vector<144x128xbf16>
    %c0_14 = arith.constant 0 : index
    %c0_15 = arith.constant 0 : index
    %18 = vector.load %arg4[%c0_14, %c0_15] : memref<144x128xbf16, #tpu.memory_space<vmem>>, vector<144x128xbf16>
    tpu.vector_store %arg4[%c0_14, %c0_15], %17 {strides = array<i32>} : memref<144x128xbf16, #tpu.memory_space<vmem>>, vector<144x128xbf16>,
    return
  }
  func.func @transform_0(%arg0: i32) -> (i32, i32, i32) {
    %c0_i32 = arith.constant 0 : i32
    %c0_i32_0 = arith.constant 0 : i32
    %c0_i32_1 = arith.constant 0 : i32
    return %arg0, %c0_i32, %c0_i32_0 : i32, i32, i32
  }
  func.func @transform_1(%arg0: i32) -> (i32, i32) {
    %c0_i32 = arith.constant 0 : i32
    %c0_i32_0 = arith.constant 0 : i32
    %c0_i32_1 = arith.constant 0 : i32
    return %c0_i32, %c0_i32_0 : i32, i32
  }
  func.func @transform_2(%arg0: i32) -> (i32, i32) {
    %c0_i32 = arith.constant 0 : i32
    %c0_i32_0 = arith.constant 0 : i32
    %c0_i32_1 = arith.constant 0 : i32
    return %c0_i32, %c0_i32_0 : i32, i32
  }
  func.func @transform_3(%arg0: i32) -> (i32, i32) {
    %c0_i32 = arith.constant 0 : i32
    %c0_i32_0 = arith.constant 0 : i32
    return %arg0, %c0_i32 : i32, i32
  }
}

module attributes {stable_mosaic.version = 11 : i64} {
  func.func @_conv_bn_pool_relu_kernel(%arg0: i32, %arg1: memref<1x64x1600xbf16, #tpu.memory_space<vmem>>, %arg2: memref<1600x128xbf16, #tpu.memory_space<vmem>>, %arg3: memref<1x128xf32, #tpu.memory_space<vmem>>, %arg4: memref<16x128xf32, #tpu.memory_space<vmem>>, %arg5: memref<64x128xf32, #tpu.memory_space<vmem>>) attributes {dimension_semantics = [#tpu.dimension_semantics<parallel>], iteration_bounds = array<i64: 2>, scalar_prefetch = 0 : i64, scratch_operands = 1 : i64, tpu.core_type = #tpu.core_type<tc>, window_params = [{transform_indices = @transform_0, window_bounds = array<i64: 1, 64, 1600>}, {pipeline_mode = #tpu.pipeline_mode<synchronous>, transform_indices = @transform_1, window_bounds = array<i64: 1600, 128>}, {pipeline_mode = #tpu.pipeline_mode<synchronous>, transform_indices = @transform_2, window_bounds = array<i64: 1, 128>}, {transform_indices = @transform_3, window_bounds = array<i64: 16, 128>}]} {
    %c0 = arith.constant 0 : index
    %c0_0 = arith.constant 0 : index
    %c0_1 = arith.constant 0 : index
    %0 = vector.load %arg1[%c0, %c0_0, %c0_1] : memref<1x64x1600xbf16, #tpu.memory_space<vmem>>, vector<1x64x1600xbf16>
    %1 = vector.shape_cast %0 : vector<1x64x1600xbf16> to vector<64x1600xbf16>
    %c0_2 = arith.constant 0 : index
    %c0_3 = arith.constant 0 : index
    %2 = vector.load %arg2[%c0_2, %c0_3] : memref<1600x128xbf16, #tpu.memory_space<vmem>>, vector<1600x128xbf16>
    %cst = arith.constant dense<0.000000e+00> : vector<64x128xf32>
    %3 = tpu.matmul %1, %2, %cst {dimension_numbers = #tpu.dot_dimension_numbers<[1], [0], [0], [1], [0, 0, 1, 1], [], []>} : vector<64x1600xbf16>, vector<1600x128xbf16>, vector<64x128xf32> -> vector<64x128xf32>
    %c0_4 = arith.constant 0 : index
    %c0_5 = arith.constant 0 : index
    %4 = vector.load %arg5[%c0_4, %c0_5] : memref<64x128xf32, #tpu.memory_space<vmem>>, vector<64x128xf32>
    tpu.vector_store %arg5[%c0_4, %c0_5], %3 {strides = array<i32>} : memref<64x128xf32, #tpu.memory_space<vmem>>, vector<64x128xf32>,
    %c0_6 = arith.constant 0 : index
    %c0_7 = arith.constant 0 : index
    %5 = vector.load %arg5[%c0_6, %c0_7] : memref<64x128xf32, #tpu.memory_space<vmem>>, vector<16x128xf32>
    %c16 = arith.constant 16 : index
    %c0_8 = arith.constant 0 : index
    %6 = vector.load %arg5[%c16, %c0_8] : memref<64x128xf32, #tpu.memory_space<vmem>>, vector<16x128xf32>
    %7 = arith.maximumf %5, %6 : vector<16x128xf32>
    %c32 = arith.constant 32 : index
    %c0_9 = arith.constant 0 : index
    %8 = vector.load %arg5[%c32, %c0_9] : memref<64x128xf32, #tpu.memory_space<vmem>>, vector<16x128xf32>
    %9 = arith.maximumf %7, %8 : vector<16x128xf32>
    %c48 = arith.constant 48 : index
    %c0_10 = arith.constant 0 : index
    %10 = vector.load %arg5[%c48, %c0_10] : memref<64x128xf32, #tpu.memory_space<vmem>>, vector<16x128xf32>
    %11 = arith.maximumf %9, %10 : vector<16x128xf32>
    %c0_11 = arith.constant 0 : index
    %c0_12 = arith.constant 0 : index
    %12 = vector.load %arg3[%c0_11, %c0_12] : memref<1x128xf32, #tpu.memory_space<vmem>>, vector<1x128xf32>
    %13 = vector.broadcast %12 : vector<1x128xf32> to vector<16x128xf32>
    %14 = arith.addf %11, %13 : vector<16x128xf32>
    %cst_13 = arith.constant 0.000000e+00 : f32
    %15 = vector.broadcast %cst_13 : f32 to vector<16x128xf32>
    %16 = arith.maximumf %14, %15 : vector<16x128xf32>
    %c0_14 = arith.constant 0 : index
    %c0_15 = arith.constant 0 : index
    %17 = vector.load %arg4[%c0_14, %c0_15] : memref<16x128xf32, #tpu.memory_space<vmem>>, vector<16x128xf32>
    tpu.vector_store %arg4[%c0_14, %c0_15], %16 {strides = array<i32>} : memref<16x128xf32, #tpu.memory_space<vmem>>, vector<16x128xf32>,
    return
  }
  func.func @transform_0(%arg0: i32) -> (i32, i32, i32) {
    %c0_i32 = arith.constant 0 : i32
    %c0_i32_0 = arith.constant 0 : i32
    %c0_i32_1 = arith.constant 0 : i32
    return %arg0, %c0_i32, %c0_i32_0 : i32, i32, i32
  }
  func.func @transform_1(%arg0: i32) -> (i32, i32) {
    %c0_i32 = arith.constant 0 : i32
    %c0_i32_0 = arith.constant 0 : i32
    %c0_i32_1 = arith.constant 0 : i32
    return %c0_i32, %c0_i32_0 : i32, i32
  }
  func.func @transform_2(%arg0: i32) -> (i32, i32) {
    %c0_i32 = arith.constant 0 : i32
    %c0_i32_0 = arith.constant 0 : i32
    %c0_i32_1 = arith.constant 0 : i32
    return %c0_i32, %c0_i32_0 : i32, i32
  }
  func.func @transform_3(%arg0: i32) -> (i32, i32) {
    %c0_i32 = arith.constant 0 : i32
    %c0_i32_0 = arith.constant 0 : i32
    return %arg0, %c0_i32 : i32, i32
  }
}

</mosaic_0001>

<bundles_post_ra>
// kernel: feature_extractor_forward.2
= control target key start
LH: loop header
LB: loop body
LE: loop exit
PB: predicated region body
PF: predicated region fallthrough
CT: control target
= control target key end

     0   :  { %s1677_s12 = smov 0   ;;  %s1906_s0 = inlined_call_operand.vmem [shape: bf16[2,576,75], index: 0, kind: input, shape index: {}]   ;;  %s1907_s1 = inlined_call_operand.vmem [shape: bf16[75,128], index: 1, kind: input, shape index: {}]   ;;  %s1908_s2 = inlined_call_operand.vmem [shape: f32[1,128], index: 2, kind: input, shape index: {}]   ;;  %s1909_s3 = inlined_call_operand.vmem [shape: bf16[288,128], index: 3, kind: output, shape index: {}]  }
   0x1 LB: > { %s1683_s13 = sadd.s32 4294967295, %s1654_s12   ;;  %p1292_p0 = scmp.ge.s32.totalorder %s1654_s12, 1  ;;  %s1654_s12 = sphi %s1677_s12, %s13_s12  }
   0x2   : > { %p137_p1 = scmp.lt.s32.totalorder %s1654_s12, 3 }
   0x4   : > { %p138_p2 = pnand %p1292_p0, %p137_p1 }
   0x5   : > { %p161_p3 = scmp.lt.s32.totalorder (!%p138_p2), %s1683_s13, 1  ;;  %s166_s29 = smul.u32 (!%p138_p2), 18, %s1683_s13 }
   0x6   : > { %141 = sbr.rel (%p138_p2) target bundleno = 312 (0x138), region = 32 }
   0x7   : > { %p167_p4 = scmp.lt.s32.totalorder (!%p138_p2), %s166_s29, 35 }
   0xb   : > { %v1607_v0 = vld [vmem:[%s1907_s1 + $0x20] sm:$0x3f]   ;;  %vm573_vm0 = vcmask 1044480   ;;  %vm574_vm1 = vcmask 1045504   ;;  %v1656_v1 = vmov 65535   ;;  %v1608_v4 = vld [vmem:[%s1907_s1 + $0x18] sm:$0xff]  }
   0xc   : > { %v575_v2 = vsel %vm573_vm0, 4294967295, %v1656_v1  ;;  %s162_s18 = scalar_select %p161_p3, %s1683_s13, 1  ;;  %v1609_v6 = vld [vmem:[%s1907_s1 + $0x10] sm:$0xff]   ;;  %v1610_v7 = vld [vmem:[%s1907_s1 + $0x8] sm:$0xff]   ;;  %vm464_vm2 = vcmask 613376   ;;  %v1611_v10 = vld [vmem:[%s1907_s1] sm:$0xff]  }
   0xd   : > { %v576_v3 = vsel %vm574_vm1, %v575_v2, 0  ;;  %s1911_s29 = smov (!%p167_p4, %s166_s29), 35 }
   0xe   : > { %v578_v5 = vand.u32 %v1607_v0, %v576_v3  ;;  %s1597_s21 = smul.u32 288, %s162_s18  ;;  %s1294_s5 = sshll.u32 %s1911_s29, 2 }
   0xf   : > { %s1850_s8 = scalar_lea.vmem %s1909_s3, %s1294_s5 }
  0x10   : > { %1505 = vmatprep.subr.bf16.mxu0 %v578_v5  ;;  %1587 = vmatprep.subr.bf16.mxu1 %v578_v5  ;;  %s1704_s26 = scalar_lea.vmem %s1906_s0, %s1597_s21 }
  0x11   : > { %1506 = vmatpush3.bf16.msra.mxu0 %v578_v5  ;;  %1592 = vmatpush3.bf16.msra.mxu1 %v578_v5  ;;  %v1612_v8 = vld [vmem:[%s1704_s26] sm:$0xff]   ;;  %v1613_v9 = vld [vmem:[%s1704_s26 + $0x90] sm:$0xff]   ;;  %v1614_v11 = vld [vmem:[%s1704_s26 + $0x8] sm:$0xff]  }
  0x12   : > { %1507 = vmatprep.subr.bf16.mxu0 %v1608_v4  ;;  %1588 = vmatprep.subr.bf16.mxu1 %v1608_v4  ;;  %v1615_v12 = vld [vmem:[%s1704_s26 + $0x98] sm:$0xff]   ;;  %v1616_v13 = vld [vmem:[%s1704_s26 + $0x10] sm:$0xff]   ;;  %v1617_v14 = vld [vmem:[%s1704_s26 + $0xa0] sm:$0xff]  }
  0x13   : > { %1515 = vmatprep.mubr.msk.bf16.mxu0 %vm464_vm2, %v1612_v8  ;;  %1551 = vmatprep.mubr.msk.bf16.mxu1 %vm464_vm2, %v1613_v9  ;;  %v1618_v15 = vld [vmem:[%s1704_s26 + $0x18] sm:$0xff]   ;;  %v1619_v16 = vld [vmem:[%s1704_s26 + $0xa8] sm:$0xff]   ;;  %v1620_v17 = vld [vmem:[%s1704_s26 + $0x20] sm:$0xff]  }
  0x14   : > { %v1621_v18 = vld [vmem:[%s1704_s26 + $0xb0] sm:$0xff]   ;;  %v1622_v19 = vld [vmem:[%s1704_s26 + $0x28] sm:$0xff]   ;;  %v1623_v20 = vld [vmem:[%s1704_s26 + $0xb8] sm:$0xff]  }
  0x15   : > { %1508 = vmatpush3.bf16.msra.mxu0 %v1608_v4  ;;  %1593 = vmatpush3.bf16.msra.mxu1 %v1608_v4  ;;  %v1624_v21 = vld [vmem:[%s1704_s26 + $0x30] sm:$0xff]   ;;  %v1625_v22 = vld [vmem:[%s1704_s26 + $0xc0] sm:$0xff]   ;;  %v1626_v23 = vld [vmem:[%s1704_s26 + $0x38] sm:$0xff]  }
  0x16   : > { %1509 = vmatprep.subr.bf16.mxu0 %v1609_v6  ;;  %1589 = vmatprep.subr.bf16.mxu1 %v1609_v6  ;;  %v1627_v24 = vld [vmem:[%s1704_s26 + $0xc8] sm:$0xff]   ;;  %v1628_v25 = vld [vmem:[%s1704_s26 + $0x40] sm:$0xff]   ;;  %v1629_v26 = vld [vmem:[%s1704_s26 + $0xd0] sm:$0xff]  }
  0x17   : > { %v1630_v27 = vld [vmem:[%s1704_s26 + $0x48] sm:$0xff]   ;;  %v1631_v28 = vld [vmem:[%s1704_s26 + $0xd8] sm:$0xff]   ;;  %v1632_v29 = vld [vmem:[%s1704_s26 + $0x50] sm:$0xff]  }
  0x18   : > { %v1633_v30 = vld [vmem:[%s1704_s26 + $0xe0] sm:$0xff]   ;;  %v1634_v31 = vld [vmem:[%s1704_s26 + $0x58] sm:$0xff]   ;;  %v1635_v32 = vld [vmem:[%s1704_s26 + $0xe8] sm:$0xff]  }
  0x19   : > { %1510 = vmatpush3.bf16.msra.mxu0 %v1609_v6  ;;  %1594 = vmatpush3.bf16.msra.mxu1 %v1609_v6  ;;  %v1636_v33 = vld [vmem:[%s1704_s26 + $0x60] sm:$0xff]   ;;  %v1637_v34 = vld [vmem:[%s1704_s26 + $0xf0] sm:$0xff]   ;;  %v1638_v35 = vld [vmem:[%s1704_s26 + $0x68] sm:$0xff]  }
  0x1a   : > { %1511 = vmatprep.subr.bf16.mxu0 %v1610_v7  ;;  %1590 = vmatprep.subr.bf16.mxu1 %v1610_v7  ;;  %v1639_v36 = vld [vmem:[%s1704_s26 + $0xf8] sm:$0xff]   ;;  %v1640_v37 = vld [vmem:[%s1704_s26 + $0x70] sm:$0xff]   ;;  %v1641_v38 = vld [vmem:[%s1704_s26 + $0x100] sm:$0xff]  }
  0x1b   : > { %v1642_v39 = vld [vmem:[%s1704_s26 + $0x78] sm:$0xff]   ;;  %v1643_v40 = vld [vmem:[%s1704_s26 + $0x108] sm:$0xff]   ;;  %v1644_v41 = vld [vmem:[%s1704_s26 + $0x80] sm:$0xff]  }
  0x1c   : > { %v1645_v42 = vld [vmem:[%s1704_s26 + $0x110] sm:$0xff]   ;;  %v1646_v43 = vld [vmem:[%s1704_s26 + $0x88] sm:$0xff]   ;;  %v1647_v44 = vld [vmem:[%s1704_s26 + $0x118] sm:$0xff]  }
  0x1d   : > { %1512 = vmatpush3.bf16.msra.mxu0 %v1610_v7  ;;  %1595 = vmatpush3.bf16.msra.mxu1 %v1610_v7 }
  0x1e   : > { %1513 = vmatprep.subr.bf16.mxu0 %v1611_v10  ;;  %1591 = vmatprep.subr.bf16.mxu1 %v1611_v10 }
  0x21   : > { %1514 = vmatpush3.bf16.msra.mxu0 %v1611_v10  ;;  %1596 = vmatpush3.bf16.msra.mxu1 %v1611_v10 }
  0x24   : > { %1516 = vmatmul.mubr.msk.bf16.vlgmr.msra.gmra.mxu0 %vm464_vm2, %v1614_v11  ;;  %1552 = vmatmul.mubr.msk.bf16.vlgmr.msra.gmra.mxu1 %vm464_vm2, %v1615_v12 }
  0x25   : > { %1519 = vmatprep.mubr.msk.bf16.mxu0 %vm464_vm2, %v1616_v13  ;;  %1555 = vmatprep.mubr.msk.bf16.mxu1 %vm464_vm2, %v1617_v14 }
  0x2c   : > { %1520 = vmatmul.mubr.msk.bf16.gmra.mxu0 %vm464_vm2, %v1618_v15  ;;  %1556 = vmatmul.mubr.msk.bf16.gmra.mxu1 %vm464_vm2, %v1619_v16 }
  0x2d   : > { %1523 = vmatprep.mubr.msk.bf16.mxu0 %vm464_vm2, %v1620_v17  ;;  %1559 = vmatprep.mubr.msk.bf16.mxu1 %vm464_vm2, %v1621_v18 }
  0x34   : > { %1524 = vmatmul.mubr.msk.bf16.gmra.mxu0 %vm464_vm2, %v1622_v19  ;;  %1560 = vmatmul.mubr.msk.bf16.gmra.mxu1 %vm464_vm2, %v1623_v20 }
  0x35   : > { %1527 = vmatprep.mubr.msk.bf16.mxu0 %vm464_vm2, %v1624_v21  ;;  %1563 = vmatprep.mubr.msk.bf16.mxu1 %vm464_vm2, %v1625_v22  ;;  %v1837_v22 = vld [vmem:[%s1908_s2] ss:$0 sm:$0xff] }
  0x3c   : > { %1528 = vmatmul.mubr.msk.bf16.gmra.mxu0 %vm464_vm2, %v1626_v23  ;;  %1564 = vmatmul.mubr.msk.bf16.gmra.mxu1 %vm464_vm2, %v1627_v24 }
  0x3d   : > { %1531 = vmatprep.mubr.msk.bf16.mxu0 %vm464_vm2, %v1628_v25  ;;  %1567 = vmatprep.mubr.msk.bf16.mxu1 %vm464_vm2, %v1629_v26 }
  0x44   : > { %1532 = vmatmul.mubr.msk.bf16.gmra.mxu0 %vm464_vm2, %v1630_v27  ;;  %1568 = vmatmul.mubr.msk.bf16.gmra.mxu1 %vm464_vm2, %v1631_v28 }
  0x45   : > { %1535 = vmatprep.mubr.msk.bf16.mxu0 %vm464_vm2, %v1632_v29  ;;  %1571 = vmatprep.mubr.msk.bf16.mxu1 %vm464_vm2, %v1633_v30 }
  0x4c   : > { %1536 = vmatmul.mubr.msk.bf16.gmra.mxu0 %vm464_vm2, %v1634_v31  ;;  %1572 = vmatmul.mubr.msk.bf16.gmra.mxu1 %vm464_vm2, %v1635_v32 }
  0x4d   : > { %1539 = vmatprep.mubr.msk.bf16.mxu0 %vm464_vm2, %v1636_v33  ;;  %1575 = vmatprep.mubr.msk.bf16.mxu1 %vm464_vm2, %v1637_v34 }
  0x54   : > { %1540 = vmatmul.mubr.msk.bf16.gmra.mxu0 %vm464_vm2, %v1638_v35  ;;  %1576 = vmatmul.mubr.msk.bf16.gmra.mxu1 %vm464_vm2, %v1639_v36 }
  0x55   : > { %1543 = vmatprep.mubr.msk.bf16.mxu0 %vm464_vm2, %v1640_v37  ;;  %1579 = vmatprep.mubr.msk.bf16.mxu1 %vm464_vm2, %v1641_v38 }
  0x5c   : > { %1544 = vmatmul.mubr.msk.bf16.gmra.mxu0 %vm464_vm2, %v1642_v39  ;;  %1580 = vmatmul.mubr.msk.bf16.gmra.mxu1 %vm464_vm2, %v1643_v40 }
  0x5d   : > { %1547 = vmatprep.mubr.msk.bf16.mxu0 %vm464_vm2, %v1644_v41  ;;  %1583 = vmatprep.mubr.msk.bf16.mxu1 %vm464_vm2, %v1645_v42 }
  0x64   : > { %1548 = vmatmul.mubr.msk.bf16.gmra.mxu0 %vm464_vm2, %v1646_v43  ;;  %1584 = vmatmul.mubr.msk.bf16.gmra.mxu1 %vm464_vm2, %v1647_v44 }
  0xe4   : > { %v1781_v45 = vpop.f32.mrf.mxu0  ;;  %v1783_v46 = vpop.f32.mrf.mxu1 }
  0xe6   : > { %v614_v47 = vpop.f32.mrf.mxu0  ;;  %v758_v48 = vpop.f32.mrf.mxu1 }
  0xe8   : > { %v1785_v49 = vpop.f32.mrf.mxu0  ;;  %v1787_v50 = vpop.f32.mrf.mxu1 }
  0xea   : > { %v617_v51 = vpop.f32.mrf.mxu0  ;;  %v761_v52 = vpop.f32.mrf.mxu1 }
  0xec   : > { %v1789_v53 = vpop.f32.mrf.mxu0  ;;  %v1791_v54 = vpop.f32.mrf.mxu1 }
  0xee   : > { %v630_v55 = vpop.f32.mrf.mxu0  ;;  %v774_v56 = vpop.f32.mrf.mxu1 }
  0xf0   : > { %v1793_v57 = vpop.f32.mrf.mxu0  ;;  %v1795_v58 = vpop.f32.mrf.mxu1 }
  0xf2   : > { %v633_v59 = vpop.f32.mrf.mxu0  ;;  %v777_v60 = vpop.f32.mrf.mxu1 }
  0xf4   : > { %v1797_v61 = vpop.f32.mrf.mxu0  ;;  %v1799_v62 = vpop.f32.mrf.mxu1 }
  0xf6   : > { %v1801_v63 = vpop.f32.mrf.mxu0  ;;  %v1803_v0 = vpop.f32.mrf.mxu1 }
  0xf8   : > { %v1805_v1 = vpop.f32.mrf.mxu0  ;;  %v1807_v2 = vpop.f32.mrf.mxu1 }
  0xfa   : > { %v1809_v3 = vpop.f32.mrf.mxu0  ;;  %v1811_v4 = vpop.f32.mrf.mxu1 }
  0xfc   : > { %v1813_v5 = vpop.f32.mrf.mxu0  ;;  %v1815_v6 = vpop.f32.mrf.mxu1 }
  0xfe   : > { %v1817_v7 = vpop.f32.mrf.mxu0  ;;  %v1819_v8 = vpop.f32.mrf.mxu1 }
 0x100   : > { %v1821_v9 = vpop.f32.mrf.mxu0  ;;  %v1823_v10 = vpop.f32.mrf.mxu1 }
 0x102   : > { %v1825_v11 = vpop.f32.mrf.mxu0  ;;  %v1827_v12 = vpop.f32.mrf.mxu1 }
 0x104   : > { %v1533_v13 = vpop.f32.mrf.mxu0  ;;  %v1569_v14 = vpop.f32.mrf.mxu1 }
 0x105   : > { %v1009_v15 = vmax.f32 %v614_v47, %v1533_v13 }
 0x106   : > { %v1830_v16 = vpop.f32.mrf.mxu0  ;;  %v1832_v17 = vpop.f32.mrf.mxu1 }
 0x107   : > { %v1045_v18 = vmax.f32 %v1009_v15, %v758_v48 }
 0x108   : > { %v1534_v19 = vpop.f32.mrf.mxu0  ;;  %v1570_v20 = vpop.f32.mrf.mxu1 }
 0x109   : > { %v1081_v21 = vmax.f32 %v1045_v18, %v1569_v14  ;;  %v1010_v23 = vmax.f32 %v617_v51, %v1534_v19 }
 0x10a   : > { %v1839_v24 = vpop.f32.mrf.mxu0  ;;  %v1841_v25 = vpop.f32.mrf.mxu1 }
 0x10b   : > { %v1046_v26 = vmax.f32 %v1010_v23, %v761_v52  ;;  %v1106_v27 = vadd.f32 %v1837_v22, %v1081_v21 }
 0x10c   : > { %v1537_v28 = vpop.f32.mrf.mxu0  ;;  %v1573_v29 = vpop.f32.mrf.mxu1 }
 0x10d   : > { %v1082_v30 = vmax.f32 %v1046_v26, %v1570_v20  ;;  %v1013_v31 = vmax.f32 %v630_v55, %v1537_v28  ;;  %v1124_v37 = vmax.f32 %v1106_v27, 0.0 }
 0x10e   : > { %v694_v32 = vpop.f32.mrf.mxu0  ;;  %v838_v33 = vpop.f32.mrf.mxu1 }
 0x10f   : > { %v1107_v34 = vadd.f32 %v1837_v22, %v1082_v30  ;;  %v1049_v35 = vmax.f32 %v1013_v31, %v774_v56  ;;  %v1011_v36 = vmax.f32 %v1781_v45, %v694_v32 }
 0x110   : > { %v1538_v38 = vpop.f32.mrf.mxu0  ;;  %v1574_v39 = vpop.f32.mrf.mxu1 }
 0x111   : > { %v1125_v40 = vmax.f32 %v1107_v34, 0.0  ;;  %v1085_v41 = vmax.f32 %v1049_v35, %v1573_v29  ;;  %v1047_v42 = vmax.f32 %v1011_v36, %v1783_v46  ;;  %v1014_v43 = vmax.f32 %v633_v59, %v1538_v38 }
 0x112   : > { %v697_v44 = vpop.f32.mrf.mxu0  ;;  %v841_v47 = vpop.f32.mrf.mxu1 }
 0x113   : > { %v1414_v48 = vpack.c.bf16 %v1125_v40, %v1124_v37  ;;  %v1050_v51 = vmax.f32 %v1014_v43, %v777_v60  ;;  %v1110_v45 = vadd.f32 %v1837_v22, %v1085_v41  ;;  %v1083_v52 = vmax.f32 %v1047_v42, %v838_v33 }
 0x114   : > { %v1012_v55 = vmax.f32 %v1785_v49, %v697_v44  ;;  %v1541_v56 = vpop.f32.mrf.mxu0  ;;  %v1577_v13 = vpop.f32.mrf.mxu1 }
 0x115   : > { %1415 = vst [vmem:[%s1850_s8] sm:$0xff] %v1414_v48   ;;  %v1086_v46 = vmax.f32 %v1050_v51, %v1574_v39  ;;  %v1017_v59 = vmax.f32 %v1801_v63, %v1541_v56  ;;  %v1128_v21 = vmax.f32 %v1110_v45, 0.0  ;;  %v1108_v23 = vadd.f32 %v1837_v22, %v1083_v52 }
 0x116   : > { %v1048_v14 = vmax.f32 %v1012_v55, %v1787_v50  ;;  %v710_v15 = vpop.f32.mrf.mxu0  ;;  %v854_v18 = vpop.f32.mrf.mxu1 }
 0x117   : > { %v1111_v19 = vadd.f32 %v1837_v22, %v1086_v46  ;;  %v1053_v20 = vmax.f32 %v1017_v59, %v1803_v0  ;;  %v1015_v60 = vmax.f32 %v1789_v53, %v710_v15  ;;  %v1126_v34 = vmax.f32 %v1108_v23, 0.0 }
 0x118   : > { %v1084_v49 = vmax.f32 %v1048_v14, %v841_v47  ;;  %v1542_v26 = vpop.f32.mrf.mxu0  ;;  %v1578_v27 = vpop.f32.mrf.mxu1 }
 0x119   : > { %v1129_v28 = vmax.f32 %v1111_v19, 0.0  ;;  %v1089_v29 = vmax.f32 %v1053_v20, %v1577_v13  ;;  %v1051_v63 = vmax.f32 %v1015_v60, %v1791_v54  ;;  %v1018_v50 = vmax.f32 %v1809_v3, %v1542_v26 }
 0x11a   : > { %v1109_v30 = vadd.f32 %v1837_v22, %v1084_v49  ;;  %v713_v31 = vpop.f32.mrf.mxu0  ;;  %v857_v32 = vpop.f32.mrf.mxu1 }
 0x11b   : > { %v1424_v0 = vpack.c.bf16 %v1129_v28, %v1128_v21  ;;  %v1087_v33 = vmax.f32 %v1051_v63, %v854_v18  ;;  %v1054_v53 = vmax.f32 %v1018_v50, %v1811_v4  ;;  %v1114_v36 = vadd.f32 %v1837_v22, %v1089_v29 }
 0x11c   : > { %v1127_v35 = vmax.f32 %v1109_v30, 0.0  ;;  %v1016_v37 = vmax.f32 %v1793_v57, %v713_v31  ;;  %v1545_v38 = vpop.f32.mrf.mxu0  ;;  %v1581_v39 = vpop.f32.mrf.mxu1 }
 0x11d   : > { %1457 = vst [vmem:[%s1850_s8 + $0x10] sm:$0xff] %v1424_v0   ;;  %v1090_v54 = vmax.f32 %v1054_v53, %v1578_v27  ;;  %v1021_v3 = vmax.f32 %v1817_v7, %v1545_v38  ;;  %v1112_v4 = vadd.f32 %v1837_v22, %v1087_v33  ;;  %v1132_v57 = vmax.f32 %v1114_v36, 0.0 }
 0x11e   : > { %v1419_v40 = vpack.c.bf16 %v1127_v35, %v1126_v34  ;;  %v1052_v41 = vmax.f32 %v1016_v37, %v1795_v58  ;;  %v726_v42 = vpop.f32.mrf.mxu0  ;;  %v870_v43 = vpop.f32.mrf.mxu1 }
 0x11f   : > { %v1115_v44 = vadd.f32 %v1837_v22, %v1090_v54  ;;  %v1057_v47 = vmax.f32 %v1021_v3, %v1819_v8  ;;  %v1019_v48 = vmax.f32 %v1797_v61, %v726_v42  ;;  %v1130_v14 = vmax.f32 %v1112_v4, 0.0 }
 0x120   : > { %1456 = vst [vmem:[%s1850_s8 + $0x8] sm:$0xff] %v1419_v40   ;;  %v1088_v51 = vmax.f32 %v1052_v41, %v857_v32  ;;  %v1546_v45 = vpop.f32.mrf.mxu0  ;;  %v1582_v52 = vpop.f32.mrf.mxu1 }
 0x121   : > { %v1133_v55 = vmax.f32 %v1115_v44, 0.0  ;;  %v1093_v7 = vmax.f32 %v1057_v47, %v1581_v39  ;;  %v1055_v58 = vmax.f32 %v1019_v48, %v1799_v62  ;;  %v1022_v56 = vmax.f32 %v1825_v11, %v1546_v45 }
 0x122   : > { %v1113_v13 = vadd.f32 %v1837_v22, %v1088_v51  ;;  %v729_v46 = vpop.f32.mrf.mxu0  ;;  %v873_v59 = vpop.f32.mrf.mxu1 }
 0x123   : > { %v1434_v8 = vpack.c.bf16 %v1133_v55, %v1132_v57  ;;  %v1058_v61 = vmax.f32 %v1022_v56, %v1827_v12  ;;  %v1118_v18 = vadd.f32 %v1837_v22, %v1093_v7  ;;  %v1091_v19 = vmax.f32 %v1055_v58, %v870_v43 }
 0x124   : > { %v1131_v15 = vmax.f32 %v1113_v13, 0.0  ;;  %v1020_v20 = vmax.f32 %v1805_v1, %v729_v46  ;;  %v1549_v60 = vpop.f32.mrf.mxu0  ;;  %v1585_v21 = vpop.f32.mrf.mxu1 }
 0x125   : > { %1459 = vst [vmem:[%s1850_s8 + $0x20] sm:$0xff] %v1434_v8   ;;  %v1094_v62 = vmax.f32 %v1058_v61, %v1582_v52  ;;  %v1025_v11 = vmax.f32 %v1830_v16, %v1549_v60  ;;  %v1136_v63 = vmax.f32 %v1118_v18, 0.0  ;;  %v1116_v1 = vadd.f32 %v1837_v22, %v1091_v19 }
 0x126   : > { %v1429_v23 = vpack.c.bf16 %v1131_v15, %v1130_v14  ;;  %v1056_v49 = vmax.f32 %v1020_v20, %v1807_v2  ;;  %v742_v26 = vpop.f32.mrf.mxu0  ;;  %v886_v29 = vpop.f32.mrf.mxu1 }
 0x127   : > { %v1119_v27 = vadd.f32 %v1837_v22, %v1094_v62  ;;  %v1061_v12 = vmax.f32 %v1025_v11, %v1832_v17  ;;  %v1023_v28 = vmax.f32 %v1813_v5, %v742_v26  ;;  %v1134_v34 = vmax.f32 %v1116_v1, 0.0 }
 0x128   : > { %1458 = vst [vmem:[%s1850_s8 + $0x18] sm:$0xff] %v1429_v23   ;;  %v1092_v50 = vmax.f32 %v1056_v49, %v873_v59  ;;  %v1550_v30 = vpop.f32.mrf.mxu0  ;;  %v1586_v5 = vpop.f32.mrf.mxu1 }
 0x129   : > { %v1137_v31 = vmax.f32 %v1119_v27, 0.0  ;;  %v1097_v16 = vmax.f32 %v1061_v12, %v1585_v21  ;;  %v1059_v32 = vmax.f32 %v1023_v28, %v1815_v6  ;;  %v1026_v2 = vmax.f32 %v1839_v24, %v1550_v30 }
 0x12a   : > { %v1117_v0 = vadd.f32 %v1837_v22, %v1092_v50  ;;  %v745_v17 = vpop.f32.mrf.mxu0  ;;  %v889_v3 = vpop.f32.mrf.mxu1 }
 0x12b   : > { %v1444_v33 = vpack.c.bf16 %v1137_v31, %v1136_v63  ;;  %v1062_v53 = vmax.f32 %v1026_v2, %v1841_v25  ;;  %v1095_v36 = vmax.f32 %v1059_v32, %v886_v29  ;;  %v1024_v37 = vmax.f32 %v1821_v9, %v745_v17 }
 0x12c   : > { %v1135_v35 = vmax.f32 %v1117_v0, 0.0  ;;  %v1122_v38 = vadd.f32 %v1837_v22, %v1097_v16 }
 0x12d   : > { %1461 = vst [vmem:[%s1850_s8 + $0x30] sm:$0xff] %v1444_v33   ;;  %v1098_v6 = vmax.f32 %v1062_v53, %v1586_v5  ;;  %v1060_v39 = vmax.f32 %v1024_v37, %v1823_v10  ;;  %v1120_v25 = vadd.f32 %v1837_v22, %v1095_v36 }
 0x12e   : > { %v1439_v24 = vpack.c.bf16 %v1135_v35, %v1134_v34  ;;  %v1140_v41 = vmax.f32 %v1122_v38, 0.0 }
 0x12f   : > { %v1123_v54 = vadd.f32 %v1837_v22, %v1098_v6  ;;  %v1096_v40 = vmax.f32 %v1060_v39, %v889_v3  ;;  %v1138_v4 = vmax.f32 %v1120_v25, 0.0 }
 0x130   : > { %1460 = vst [vmem:[%s1850_s8 + $0x28] sm:$0xff] %v1439_v24  }
 0x131   : > { %v1141_v42 = vmax.f32 %v1123_v54, 0.0  ;;  %v1121_v9 = vadd.f32 %v1837_v22, %v1096_v40 }
 0x133   : > { %v1454_v43 = vpack.c.bf16 %v1141_v42, %v1140_v41  ;;  %v1139_v44 = vmax.f32 %v1121_v9, 0.0 }
 0x135   : > { %1463 = vst [vmem:[%s1850_s8 + $0x40] sm:$0xff] %v1454_v43   ;;  %v1449_v47 = vpack.c.bf16 %v1139_v44, %v1138_v4 }
 0x137   : > { %1462 = vst [vmem:[%s1850_s8 + $0x38] sm:$0xff] %v1449_v47  }
 0x138 PF: > { %s13_s12 = sadd.s32 1, %s1654_s12  }
 0x139   : > { %p10_p5 = scmp.ge.s32.totalorder %s13_s12, 4  }
 0x13b   :  { %12 = sbr.rel (!%p10_p5) target bundleno = 1 (0x1), region = 62 }

// kernel: feature_extractor_forward.3
= control target key start
LH: loop header
LB: loop body
LE: loop exit
PB: predicated region body
PF: predicated region fallthrough
CT: control target
= control target key end

     0   :  { %8 = vsyncpa [#allocation4], 0  ;;  %s3141_s0 = inlined_call_operand.vmem [shape: bf16[2,64,1600], index: 0, kind: input, shape index: {}]   ;;  %s3142_s1 = inlined_call_operand.vmem [shape: bf16[1600,128], index: 1, kind: input, shape index: {}]   ;;  %s3143_s2 = inlined_call_operand.vmem [shape: f32[1,128], index: 2, kind: input, shape index: {}]   ;;  %s3144_s3 = inlined_call_operand.hbm [shape: f32[32,128], index: 3, kind: output, shape index: {}]  }
   0x1   :  { %10 = vsyncpa [#allocation4 + $0x1], 0  ;;  %s2610_s12 = smov 0   ;;  %s2612_s13 = smov 0  }
   0x2   :  { %s2614_s14 = smov 0   ;;  %s2616_s15 = smov 0  }
   0x3 LB: > { %s2631_s16 = sadd.s32 4294967295, %s2585_s15   ;;  %s1866_s17 = sadd.s32 4294967294, %s2585_s15   ;;  %s2585_s15 = sphi %s2616_s15, %s3168_s15   ;;  %s2581_s14 = sphi %s2614_s14, %s3167_s14   ;;  %s2577_s13 = sphi %s2612_s13, %s3166_s13   ;;  %s2573_s12 = sphi %s2610_s12, %s3165_s12  }
   0x4   : > { %s2635_s18 = sadd.s32 1, %s2585_s15   ;;  %s91_s19 = sadd.s32 1, %s2581_s14 }
   0x5   : > { %s88_s20 = ssub.s32 %s2585_s15, %s2635_s18  ;;  %p101_p0 = scmp.ne.s32.totalorder %s2581_s14, %s2577_s13 }
   0x6   : > { %p89_p1 = scmp.eq.s32.totalorder %s88_s20, 0  ;;  %p102_p2 = scmp.eq.s32.totalorder %s2631_s16, 1 }
   0x7   : > { %p107_p3 = scmp.ne.s32.totalorder %s2577_s13, %s2573_s12  ;;  %p108_p4 = scmp.eq.s32.totalorder %s1866_s17, 1 }
   0x8   : > { %s2646_s21 = scalar_select %p89_p1, %s2581_s14, %s91_s19  }
   0x9   : > { %p2648_p5 = por %p102_p2, %p101_p0  ;;  %p2652_p6 = por %p108_p4, %p107_p3 }
   0xa   : > { %p1869_p7 = scmp.ge.s32.totalorder %s2585_s15, 1  ;;  %p140_p8 = scmp.lt.s32.totalorder %s2585_s15, 3 }
   0xc   : > { %p141_p9 = pnand %p1869_p7, %p140_p8 }
   0xe   : > { %144 = sbr.rel (%p141_p9) target bundleno = 374 (0x176), region = 32 }
  0x13   : > { %v2349_v0 = vld [vmem:[%s3142_s1 + $0x78] sm:$0xff]   ;;  %v2353_v4 = vld [vmem:[%s3142_s1 + $0x70] sm:$0xff]   ;;  %v2357_v8 = vld [vmem:[%s3142_s1 + $0x68] sm:$0xff]   ;;  %p164_p10 = scmp.lt.s32.totalorder %s2631_s16, 1  ;;  %vm1287_vm0 = vcmask 523264   ;;  %s2034_s24 = sshll.u32 %s2631_s16, 8 }
  0x14   : > { %v2350_v1 = vld [vmem:[%s3142_s1 + $0xf8] sm:$0xff]   ;;  %2035 = vmatprep.subr.bf16.mxu0 %v2349_v0  ;;  %v2354_v5 = vld [vmem:[%s3142_s1 + $0xf0] sm:$0xff]   ;;  %v2358_v9 = vld [vmem:[%s3142_s1 + $0xe8] sm:$0xff]   ;;  %s3097_s29 = scalar_lea.hbm %s3144_s3, %s2034_s24 }
  0x15   : > { %v2351_v2 = vld [vmem:[%s3142_s1 + $0x38] sm:$0xff]   ;;  %2075 = vmatprep.subr.bf16.mxu1 %v2350_v1  ;;  %v2355_v6 = vld [vmem:[%s3142_s1 + $0x30] sm:$0xff]   ;;  %v2359_v10 = vld [vmem:[%s3142_s1 + $0x28] sm:$0xff]   ;;  %s165_s5 = scalar_select %p164_p10, %s2631_s16, 1 }
  0x16   : > { %v2352_v3 = vld [vmem:[%s3142_s1 + $0xb8] sm:$0xff]   ;;  %2036 = vmatpush3.bf16.msra.mxu0 %v2351_v2  ;;  %v2356_v7 = vld [vmem:[%s3142_s1 + $0xb0] sm:$0xff]   ;;  %v2360_v11 = vld [vmem:[%s3142_s1 + $0xa8] sm:$0xff]   ;;  %s2587_s16 = smov [#allocation3]  }
  0x17   : > { %2076 = vmatpush3.bf16.msra.mxu1 %v2352_v3  ;;  %2037 = vmatprep.subr.bf16.mxu0 %v2353_v4  ;;  %v2361_v12 = vld [vmem:[%s3142_s1 + $0x60] sm:$0xff]   ;;  %v2365_v16 = vld [vmem:[%s3142_s1 + $0x58] sm:$0xff]   ;;  %v2369_v20 = vld [vmem:[%s3142_s1 + $0x50] sm:$0xff]   ;;  %s2307_s20 = smul.u32 416, %s165_s5  ;;  %s2529_s5 = sshll.u32 %s2587_s16, 4  ;;  %s2530_s5 = int_to_ptr.vmem [resolvable:$false] %s2529_s5 }
  0x18   : > { %2077 = vmatprep.subr.bf16.mxu1 %v2354_v5  ;;  %v2362_v13 = vld [vmem:[%s3142_s1 + $0xe0] sm:$0xff]   ;;  %v2366_v17 = vld [vmem:[%s3142_s1 + $0xd8] sm:$0xff]   ;;  %v2370_v21 = vld [vmem:[%s3142_s1 + $0xd0] sm:$0xff]   ;;  %s2531_s6 = scalar_lea.vmem %s2530_s5, 512 }
  0x19   : > { %v2363_v14 = vld [vmem:[%s3142_s1 + $0x20] sm:$0xff]   ;;  %v2367_v18 = vld [vmem:[%s3142_s1 + $0x18] sm:$0xff]   ;;  %v2371_v22 = vld [vmem:[%s3142_s1 + $0x10] sm:$0xff]   ;;  %s2753_s7 = scalar_lea.vmem %s3141_s0, %s2307_s20 }
  0x1a   : > { %2038 = vmatpush3.bf16.msra.mxu0 %v2355_v6  ;;  %v2364_v15 = vld [vmem:[%s3142_s1 + $0xa0] sm:$0xff]   ;;  %v2368_v19 = vld [vmem:[%s3142_s1 + $0x98] sm:$0xff]   ;;  %v2372_v23 = vld [vmem:[%s3142_s1 + $0x90] sm:$0xff]  }
  0x1b   : > { %2078 = vmatpush3.bf16.msra.mxu1 %v2356_v7  ;;  %2039 = vmatprep.subr.bf16.mxu0 %v2357_v8  ;;  %v2373_v24 = vld [vmem:[%s3142_s1 + $0x48] sm:$0xff]   ;;  %v2377_v28 = vld [vmem:[%s3142_s1 + $0x40] sm:$0xff]   ;;  %v2387_v36 = vld [vmem:[%s3142_s1 + $0x178] sm:$0xff]  }
  0x1c   : > { %2079 = vmatprep.subr.bf16.mxu1 %v2358_v9  ;;  %v2374_v25 = vld [vmem:[%s3142_s1 + $0xc8] sm:$0xff]   ;;  %v2378_v29 = vld [vmem:[%s3142_s1 + $0xc0] sm:$0xff]   ;;  %v2388_v37 = vld [vmem:[%s3142_s1 + $0x1f8] sm:$0xff]  }
  0x1d   : > { %v2375_v26 = vld [vmem:[%s3142_s1 + $0x8] sm:$0xff]   ;;  %v2379_v30 = vld [vmem:[%s3142_s1] sm:$0xff]   ;;  %v2389_v38 = vld [vmem:[%s3142_s1 + $0x138] sm:$0xff]  }
  0x1e   : > { %2040 = vmatpush3.bf16.msra.mxu0 %v2359_v10  ;;  %v2376_v27 = vld [vmem:[%s3142_s1 + $0x88] sm:$0xff]   ;;  %v2380_v31 = vld [vmem:[%s3142_s1 + $0x80] sm:$0xff]   ;;  %v2390_v39 = vld [vmem:[%s3142_s1 + $0x1b8] sm:$0xff]  }
  0x1f   : > { %2080 = vmatpush3.bf16.msra.mxu1 %v2360_v11  ;;  %2041 = vmatprep.subr.bf16.mxu0 %v2361_v12  ;;  %v2381_v32 = vld [vmem:[%s2753_s7] ss:$52 sps:$4 sm:$0xff]   ;;  %v2383_v33 = vld [vmem:[%s2753_s7 + $0x4] ss:$52 sps:$4 sm:$0xff]   ;;  %v2384_v34 = vld [vmem:[%s2753_s7 + $0x8] ss:$52 sps:$4 sm:$0xff]  }
  0x20   : > { %2081 = vmatprep.subr.bf16.mxu1 %v2362_v13  ;;  %v2386_v35 = vld [vmem:[%s2753_s7 + $0xc] ss:$52 sps:$4 sm:$0xff]   ;;  %1332 = vmatprep.mubr.bf16.mxu0 %v2383_v33  ;;  %v2391_v40 = vld [vmem:[%s3142_s1 + $0x170] sm:$0xff]   ;;  %v2399_v46 = vld [vmem:[%s2753_s7 + $0x68] ss:$52 sps:$4 sm:$0xff]  }
  0x21   : > { %1397 = vmatprep.mubr.bf16.mxu1 %v2386_v35  ;;  %v2392_v41 = vld [vmem:[%s3142_s1 + $0x1f0] sm:$0xff]   ;;  %v2395_v44 = vld [vmem:[%s2753_s7 + $0x6c] ss:$52 sps:$4 sm:$0xff]   ;;  %v2415_v60 = vld [vmem:[%s3142_s1 + $0x158] sm:$0xff]  }
  0x22   : > { %2042 = vmatpush3.bf16.msra.mxu0 %v2363_v14  ;;  %v2393_v42 = vld [vmem:[%s3142_s1 + $0x130] sm:$0xff]   ;;  %v2401_v48 = vld [vmem:[%s3142_s1 + $0x168] sm:$0xff]   ;;  %v2405_v52 = vld [vmem:[%s3142_s1 + $0x160] sm:$0xff]  }
  0x23   : > { %2082 = vmatpush3.bf16.msra.mxu1 %v2364_v15  ;;  %2043 = vmatprep.subr.bf16.mxu0 %v2365_v16  ;;  %v2394_v43 = vld [vmem:[%s3142_s1 + $0x1b0] sm:$0xff]   ;;  %v2402_v49 = vld [vmem:[%s3142_s1 + $0x1e8] sm:$0xff]   ;;  %v2406_v53 = vld [vmem:[%s3142_s1 + $0x1e0] sm:$0xff]  }
  0x24   : > { %2083 = vmatprep.subr.bf16.mxu1 %v2366_v17  ;;  %v2397_v45 = vld [vmem:[%s2753_s7 + $0x74] ss:$52 sps:$4 sm:$0xff]   ;;  %v2400_v47 = vld [vmem:[%s2753_s7 + $0x70] ss:$52 sps:$4 sm:$0xff]   ;;  %v2414_v59 = vld [vmem:[%s2753_s7 + $0xd8] ss:$52 sps:$4 sm:$0xff]  }
  0x25   : > { %v2403_v50 = vld [vmem:[%s3142_s1 + $0x128] sm:$0xff]   ;;  %v2407_v54 = vld [vmem:[%s3142_s1 + $0x120] sm:$0xff]   ;;  %v2411_v57 = vld [vmem:[%s2753_s7 + $0xdc] ss:$52 sps:$4 sm:$0xff]  }
  0x26   : > { %2044 = vmatpush3.bf16.msra.mxu0 %v2367_v18  ;;  %v2404_v51 = vld [vmem:[%s3142_s1 + $0x1a8] sm:$0xff]   ;;  %v2408_v55 = vld [vmem:[%s3142_s1 + $0x1a0] sm:$0xff]   ;;  %v2416_v61 = vld [vmem:[%s3142_s1 + $0x1d8] sm:$0xff]  }
  0x27   : > { %2084 = vmatpush3.bf16.msra.mxu1 %v2368_v19  ;;  %2045 = vmatprep.subr.bf16.mxu0 %v2369_v20  ;;  %v2409_v56 = vld [vmem:[%s2753_s7 + $0xd4] ss:$52 sps:$4 sm:$0xff]   ;;  %v2413_v58 = vld [vmem:[%s2753_s7 + $0xd0] ss:$52 sps:$4 sm:$0xff]   ;;  %v2417_v62 = vld [vmem:[%s3142_s1 + $0x118] sm:$0xff]  }
  0x28   : > { %2085 = vmatprep.subr.bf16.mxu1 %v2370_v21  ;;  %v2418_v63 = vld [vmem:[%s3142_s1 + $0x198] sm:$0xff]   ;;  %v2419_v0 = vld [vmem:[%s3142_s1 + $0x150] sm:$0xff]   ;;  %v2429_v8 = vld [vmem:[%s3142_s1 + $0x148] sm:$0xff]  }
  0x29   : > { %v2420_v1 = vld [vmem:[%s3142_s1 + $0x1d0] sm:$0xff]   ;;  %v2425_v5 = vld [vmem:[%s2753_s7 + $0x144] ss:$52 sps:$4 sm:$0xff]   ;;  %v2430_v9 = vld [vmem:[%s3142_s1 + $0x1c8] sm:$0xff]  }
  0x2a   : > { %2046 = vmatpush3.bf16.msra.mxu0 %v2371_v22  ;;  %v2421_v2 = vld [vmem:[%s3142_s1 + $0x110] sm:$0xff]   ;;  %v2427_v6 = vld [vmem:[%s2753_s7 + $0x138] ss:$52 sps:$4 sm:$0xff]   ;;  %v2433_v12 = vld [vmem:[%s3142_s1 + $0x140] sm:$0xff]  }
  0x2b   : > { %2086 = vmatpush3.bf16.msra.mxu1 %v2372_v23  ;;  %2047 = vmatprep.subr.bf16.mxu0 %v2373_v24  ;;  %v2422_v3 = vld [vmem:[%s3142_s1 + $0x190] sm:$0xff]   ;;  %v2431_v10 = vld [vmem:[%s3142_s1 + $0x108] sm:$0xff]   ;;  %v2434_v13 = vld [vmem:[%s3142_s1 + $0x1c0] sm:$0xff]  }
  0x2c   : > { %2087 = vmatprep.subr.bf16.mxu1 %v2374_v25  ;;  %v2423_v4 = vld [vmem:[%s2753_s7 + $0x13c] ss:$52 sps:$4 sm:$0xff]   ;;  %v2428_v7 = vld [vmem:[%s2753_s7 + $0x140] ss:$52 sps:$4 sm:$0xff]   ;;  %v2432_v11 = vld [vmem:[%s3142_s1 + $0x188] sm:$0xff]  }
  0x2d   : > { %v2435_v14 = vld [vmem:[%s3142_s1 + $0x100] sm:$0xff]   ;;  %v2439_v17 = vld [vmem:[%s2753_s7 + $0x14] ss:$52 sps:$4 sm:$0xff]   ;;  %v2440_v18 = vld [vmem:[%s2753_s7 + $0x18] ss:$52 sps:$4 sm:$0xff]  }
  0x2e   : > { %2048 = vmatpush3.bf16.msra.mxu0 %v2375_v26  ;;  %v2436_v15 = vld [vmem:[%s3142_s1 + $0x180] sm:$0xff]   ;;  %v2442_v19 = vld [vmem:[%s2753_s7 + $0x1c] ss:$52 sps:$4 sm:$0xff]   ;;  %v2458_v33 = vld [vmem:[%s3142_s1 + $0x2e8] sm:$0xff]  }
  0x2f   : > { %2088 = vmatpush3.bf16.msra.mxu1 %v2376_v27  ;;  %2049 = vmatprep.subr.bf16.mxu0 %v2377_v28  ;;  %v2437_v16 = vld [vmem:[%s2753_s7 + $0x10] ss:$52 sps:$4 sm:$0xff]   ;;  %v2443_v20 = vld [vmem:[%s3142_s1 + $0x278] sm:$0xff]   ;;  %v2460_v35 = vld [vmem:[%s3142_s1 + $0x2a8] sm:$0xff]  }
  0x30   : > { %2089 = vmatprep.subr.bf16.mxu1 %v2378_v29  ;;  %v2444_v21 = vld [vmem:[%s3142_s1 + $0x2f8] sm:$0xff]   ;;  %v2447_v24 = vld [vmem:[%s3142_s1 + $0x270] sm:$0xff]  }
  0x31   : > { %v2445_v22 = vld [vmem:[%s3142_s1 + $0x238] sm:$0xff]   ;;  %v2448_v25 = vld [vmem:[%s3142_s1 + $0x2f0] sm:$0xff]  }
  0x32   : > { %2050 = vmatpush3.bf16.msra.mxu0 %v2379_v30  ;;  %v2446_v23 = vld [vmem:[%s3142_s1 + $0x2b8] sm:$0xff]   ;;  %v2449_v26 = vld [vmem:[%s3142_s1 + $0x230] sm:$0xff]  }
  0x33   : > { %2090 = vmatpush3.bf16.msra.mxu1 %v2380_v31  ;;  %2115 = vmatprep.subr.bf16.mxu0 %v2387_v36  ;;  %v2450_v27 = vld [vmem:[%s3142_s1 + $0x2b0] sm:$0xff]   ;;  %v2453_v29 = vld [vmem:[%s2753_s7 + $0x84] ss:$52 sps:$4 sm:$0xff]  }
  0x34   : > { %2155 = vmatprep.subr.bf16.mxu1 %v2388_v37  ;;  %v2451_v28 = vld [vmem:[%s2753_s7 + $0x7c] ss:$52 sps:$4 sm:$0xff]   ;;  %v2455_v30 = vld [vmem:[%s2753_s7 + $0x78] ss:$52 sps:$4 sm:$0xff]   ;;  %v2456_v31 = vld [vmem:[%s2753_s7 + $0x80] ss:$52 sps:$4 sm:$0xff]  }
  0x35   : > { %1333 = vmatmul.mubr.bf16.vlgmr.msra.gmra.mxu0 %v2381_v32  ;;  %v2457_v32 = vld [vmem:[%s3142_s1 + $0x268] sm:$0xff]   ;;  %v2461_v36 = vld [vmem:[%s3142_s1 + $0x260] sm:$0xff]  }
  0x36   : > { %1398 = vmatmul.mubr.bf16.vlgmr.msra.gmra.mxu1 %v2384_v34  ;;  %2116 = vmatpush3.bf16.msra.mxu0 %v2389_v38  ;;  %v2459_v34 = vld [vmem:[%s3142_s1 + $0x228] sm:$0xff]   ;;  %v2462_v37 = vld [vmem:[%s3142_s1 + $0x2e0] sm:$0xff]  }
  0x37   : > { %2156 = vmatpush3.bf16.msra.mxu1 %v2390_v39  ;;  %2117 = vmatprep.subr.bf16.mxu0 %v2391_v40  ;;  %v2463_v38 = vld [vmem:[%s3142_s1 + $0x220] sm:$0xff]  }
  0x38   : > { %2157 = vmatprep.subr.bf16.mxu1 %v2392_v41  ;;  %1340 = vmatprep.mubr.bf16.mxu0 %v2395_v44  ;;  %v2464_v39 = vld [vmem:[%s3142_s1 + $0x2a0] sm:$0xff]   ;;  %v2471_v44 = vld [vmem:[%s3142_s1 + $0x258] sm:$0xff]  }
  0x39   : > { %1405 = vmatprep.mubr.bf16.mxu1 %v2397_v45  ;;  %v2465_v40 = vld [vmem:[%s2753_s7 + $0xe4] ss:$52 sps:$4 sm:$0xff]   ;;  %v2467_v41 = vld [vmem:[%s2753_s7 + $0xec] ss:$52 sps:$4 sm:$0xff]  }
  0x3a   : > { %2118 = vmatpush3.bf16.msra.mxu0 %v2393_v42  ;;  %v2469_v42 = vld [vmem:[%s2753_s7 + $0xe0] ss:$52 sps:$4 sm:$0xff]   ;;  %v2472_v45 = vld [vmem:[%s3142_s1 + $0x2d8] sm:$0xff]  }
  0x3b   : > { %2158 = vmatpush3.bf16.msra.mxu1 %v2394_v43  ;;  %2119 = vmatprep.subr.bf16.mxu0 %v2401_v48  ;;  %v2470_v43 = vld [vmem:[%s2753_s7 + $0xe8] ss:$52 sps:$4 sm:$0xff]   ;;  %v2475_v48 = vld [vmem:[%s3142_s1 + $0x250] sm:$0xff]  }
  0x3c   : > { %2159 = vmatprep.subr.bf16.mxu1 %v2402_v49  ;;  %v2476_v49 = vld [vmem:[%s3142_s1 + $0x2d0] sm:$0xff]  }
  0x3d   : > { %1341 = vmatmul.mubr.bf16.gmra.mxu0 %v2399_v46  ;;  %v2473_v46 = vld [vmem:[%s3142_s1 + $0x218] sm:$0xff]  }
  0x3e   : > { %1406 = vmatmul.mubr.bf16.gmra.mxu1 %v2400_v47  ;;  %2120 = vmatpush3.bf16.msra.mxu0 %v2403_v50  ;;  %v2474_v47 = vld [vmem:[%s3142_s1 + $0x298] sm:$0xff]   ;;  %v2477_v50 = vld [vmem:[%s3142_s1 + $0x210] sm:$0xff]  }
  0x3f   : > { %2160 = vmatpush3.bf16.msra.mxu1 %v2404_v51  ;;  %2121 = vmatprep.subr.bf16.mxu0 %v2405_v52  ;;  %v2478_v51 = vld [vmem:[%s3142_s1 + $0x290] sm:$0xff]   ;;  %v2479_v52 = vld [vmem:[%s2753_s7 + $0x14c] ss:$52 sps:$4 sm:$0xff]  }
  0x40   : > { %2161 = vmatprep.subr.bf16.mxu1 %v2406_v53  ;;  %1348 = vmatprep.mubr.bf16.mxu0 %v2409_v56  ;;  %v2481_v53 = vld [vmem:[%s2753_s7 + $0x154] ss:$52 sps:$4 sm:$0xff]  }
  0x41   : > { %1413 = vmatprep.mubr.bf16.mxu1 %v2411_v57  ;;  %v2485_v56 = vld [vmem:[%s3142_s1 + $0x248] sm:$0xff]  }
  0x42   : > { %2122 = vmatpush3.bf16.msra.mxu0 %v2407_v54  ;;  %v2483_v54 = vld [vmem:[%s2753_s7 + $0x148] ss:$52 sps:$4 sm:$0xff]  }
  0x43   : > { %2162 = vmatpush3.bf16.msra.mxu1 %v2408_v55  ;;  %2123 = vmatprep.subr.bf16.mxu0 %v2415_v60  ;;  %v2484_v55 = vld [vmem:[%s2753_s7 + $0x150] ss:$52 sps:$4 sm:$0xff]   ;;  %v2486_v57 = vld [vmem:[%s3142_s1 + $0x2c8] sm:$0xff]  }
  0x44   : > { %2163 = vmatprep.subr.bf16.mxu1 %v2416_v61  ;;  %v2489_v60 = vld [vmem:[%s3142_s1 + $0x240] sm:$0xff]  }
  0x45   : > { %1349 = vmatmul.mubr.bf16.gmra.mxu0 %v2413_v58  ;;  %v2487_v58 = vld [vmem:[%s3142_s1 + $0x208] sm:$0xff]   ;;  %v2490_v61 = vld [vmem:[%s3142_s1 + $0x2c0] sm:$0xff]  }
  0x46   : > { %1414 = vmatmul.mubr.bf16.gmra.mxu1 %v2414_v59  ;;  %2124 = vmatpush3.bf16.msra.mxu0 %v2417_v62  ;;  %v2488_v59 = vld [vmem:[%s3142_s1 + $0x288] sm:$0xff]   ;;  %v2491_v62 = vld [vmem:[%s3142_s1 + $0x200] sm:$0xff]  }
  0x47   : > { %2164 = vmatpush3.bf16.msra.mxu1 %v2418_v63  ;;  %2125 = vmatprep.subr.bf16.mxu0 %v2419_v0  ;;  %v2492_v63 = vld [vmem:[%s3142_s1 + $0x280] sm:$0xff]  }
  0x48   : > { %2165 = vmatprep.subr.bf16.mxu1 %v2420_v1  ;;  %1356 = vmatprep.mubr.bf16.mxu0 %v2423_v4  ;;  %v2493_v0 = vld [vmem:[%s2753_s7 + $0x20] ss:$52 sps:$4 sm:$0xff]   ;;  %v2495_v1 = vld [vmem:[%s2753_s7 + $0x24] ss:$52 sps:$4 sm:$0xff]  }
  0x49   : > { %1421 = vmatprep.mubr.bf16.mxu1 %v2425_v5  ;;  %v2499_v4 = vld [vmem:[%s3142_s1 + $0x318] sm:$0xff]   ;;  %v2500_v5 = vld [vmem:[%s2753_s7 + $0x8c] ss:$52 sps:$4 sm:$0xff]  }
  0x4a   : > { %2126 = vmatpush3.bf16.msra.mxu0 %v2421_v2  ;;  %v2496_v2 = vld [vmem:[%s2753_s7 + $0x28] ss:$52 sps:$4 sm:$0xff]  }
  0x4b   : > { %2166 = vmatpush3.bf16.msra.mxu1 %v2422_v3  ;;  %2127 = vmatprep.subr.bf16.mxu0 %v2429_v8  ;;  %v2498_v3 = vld [vmem:[%s2753_s7 + $0x2c] ss:$52 sps:$4 sm:$0xff]   ;;  %v2504_v8 = vld [vmem:[%s2753_s7 + $0x88] ss:$52 sps:$4 sm:$0xff]  }
  0x4c   : > { %2167 = vmatprep.subr.bf16.mxu1 %v2430_v9  ;;  %v2505_v9 = vld [vmem:[%s2753_s7 + $0x90] ss:$52 sps:$4 sm:$0xff]  }
  0x4d   : > { %1357 = vmatmul.mubr.bf16.gmra.mxu0 %v2427_v6  ;;  %v2502_v6 = vld [vmem:[%s2753_s7 + $0x94] ss:$52 sps:$4 sm:$0xff]  }
  0x4e   : > { %1422 = vmatmul.mubr.bf16.gmra.mxu1 %v2428_v7  ;;  %2128 = vmatpush3.bf16.msra.mxu0 %v2431_v10  ;;  %v2506_v7 = vld [vmem:[%s3142_s1 + $0x310] sm:$0xff]  }
  0x4f   : > { %2168 = vmatpush3.bf16.msra.mxu1 %v2432_v11  ;;  %2129 = vmatprep.subr.bf16.mxu0 %v2433_v12  ;;  %v2507_v10 = vld [vmem:[%s2753_s7 + $0xf4] ss:$52 sps:$4 sm:$0xff]   ;;  %v2509_v11 = vld [vmem:[%s2753_s7 + $0xfc] ss:$52 sps:$4 sm:$0xff]  }
  0x50   : > { %2169 = vmatprep.subr.bf16.mxu1 %v2434_v13  ;;  %1462 = vmatprep.mubr.bf16.mxu0 %v2439_v17  ;;  %v2513_v12 = vld [vmem:[%s3142_s1 + $0x308] sm:$0xff]   ;;  %v2520_v13 = vld [vmem:[%s3142_s1 + $0x300] sm:$0xff]  }
  0x51   : > { %1527 = vmatprep.mubr.bf16.mxu1 %v2442_v19  ;;  %v2516_v17 = vld [vmem:[%s2753_s7 + $0x164] ss:$52 sps:$4 sm:$0xff]   ;;  %v2519_v19 = vld [vmem:[%s2753_s7 + $0x160] ss:$52 sps:$4 sm:$0xff]  }
  0x52   : > { %2130 = vmatpush3.bf16.msra.mxu0 %v2435_v14  ;;  %v2511_v14 = vld [vmem:[%s2753_s7 + $0xf0] ss:$52 sps:$4 sm:$0xff]  }
  0x53   : > { %2170 = vmatpush3.bf16.msra.mxu1 %v2436_v15  ;;  %2195 = vmatprep.subr.bf16.mxu0 %v2443_v20  ;;  %v2512_v15 = vld [vmem:[%s2753_s7 + $0xf8] ss:$52 sps:$4 sm:$0xff]   ;;  %v2521_v20 = vld [vmem:[%s2753_s7 + $0x30] ss:$52 sps:$4 sm:$0xff]  }
  0x54   : > { %2235 = vmatprep.subr.bf16.mxu1 %v2444_v21  ;;  %v2522_v21 = vld [vmem:[%s2753_s7 + $0x100] ss:$52 sps:$4 sm:$0xff]  }
  0x55   : > { %1463 = vmatmul.mubr.bf16.vlgmr.msra.gmra.mxu0 %v2437_v16  ;;  %v2514_v16 = vld [vmem:[%s2753_s7 + $0x15c] ss:$52 sps:$4 sm:$0xff]  }
  0x56   : > { %1528 = vmatmul.mubr.bf16.vlgmr.msra.gmra.mxu1 %v2440_v18  ;;  %2196 = vmatpush3.bf16.msra.mxu0 %v2445_v22  ;;  %v2518_v18 = vld [vmem:[%s2753_s7 + $0x158] ss:$52 sps:$4 sm:$0xff]  }
  0x57   : > { %2236 = vmatpush3.bf16.msra.mxu1 %v2446_v23  ;;  %2197 = vmatprep.subr.bf16.mxu0 %v2447_v24  ;;  %v2523_v22 = vld [vmem:[%s2753_s7 + $0x98] ss:$52 sps:$4 sm:$0xff]   ;;  %v2524_v23 = vld [vmem:[%s2753_s7 + $0x168] ss:$52 sps:$4 sm:$0xff]   ;;  %s161_s7 = sand.u32 1, %s2577_s13  }
  0x58   : > { %2237 = vmatprep.subr.bf16.mxu1 %v2448_v25  ;;  %1470 = vmatprep.mubr.bf16.mxu0 %v2451_v28  ;;  %s1870_s20 = sshll.u32 %s161_s7, 4  ;;  %s3101_s30 = scalar_lea.sflag [#allocation4], %s161_s7 }
  0x59   : > { %1535 = vmatprep.mubr.bf16.mxu1 %v2453_v29  ;;  %s163_s25 = scalar_lea.vmem [#allocation3], %s1870_s20 }
  0x5a   : > { %2198 = vmatpush3.bf16.msra.mxu0 %v2449_v26  ;;  %s1804_s26 = sshll.u32 %s163_s25, 4  ;;  %s3099_s26 = int_to_ptr.vmem [resolvable:$true] %s1804_s26 }
  0x5b   : > { %2238 = vmatpush3.bf16.msra.mxu1 %v2450_v27  ;;  %2199 = vmatprep.subr.bf16.mxu0 %v2457_v32  ;;  %s2525_s4 = scalar_lea.vmem %s3099_s26, 256  ;;  %p2532_p0 = scmp.lt.s32.totalorder %s3099_s26, %s2530_s5 }
  0x5c   : > { %2239 = vmatprep.subr.bf16.mxu1 %v2458_v33  ;;  %p2526_p11 = scmp.ne.s32.totalorder %s3099_s26, %s2525_s4  ;;  %p2533_p1 = scmp.lt.s32.totalorder %s2531_s6, %s2525_s4 }
  0x5d   : > { %1471 = vmatmul.mubr.bf16.gmra.mxu0 %v2455_v30 }
  0x5e   : > { %1536 = vmatmul.mubr.bf16.gmra.mxu1 %v2456_v31  ;;  %2200 = vmatpush3.bf16.msra.mxu0 %v2459_v34  ;;  %p2527_p12 = pnand %p2526_p11, %p2648_p5  ;;  %p2534_p2 = por %p2533_p1, %p2532_p0 }
  0x5f   : > { %2240 = vmatpush3.bf16.msra.mxu1 %v2460_v35  ;;  %2201 = vmatprep.subr.bf16.mxu0 %v2461_v36 }
  0x60   : > { %2241 = vmatprep.subr.bf16.mxu1 %v2462_v37  ;;  %1478 = vmatprep.mubr.bf16.mxu0 %v2465_v40  ;;  %p2528_p13 = pneg %p2527_p12 }
  0x61   : > { %1543 = vmatprep.mubr.bf16.mxu1 %v2467_v41 }
  0x62   : > { %2202 = vmatpush3.bf16.msra.mxu0 %v2463_v38  ;;  %p2535_p3 = pnand %p2534_p2, %p2528_p13 }
  0x63   : > { %2242 = vmatpush3.bf16.msra.mxu1 %v2464_v39  ;;  %2203 = vmatprep.subr.bf16.mxu0 %v2471_v44 }
  0x64   : > { %2243 = vmatprep.subr.bf16.mxu1 %v2472_v45 }
  0x65   : > { %1479 = vmatmul.mubr.bf16.gmra.mxu0 %v2469_v42 }
  0x66   : > { %1544 = vmatmul.mubr.bf16.gmra.mxu1 %v2470_v43  ;;  %2204 = vmatpush3.bf16.msra.mxu0 %v2473_v46 }
  0x67   : > { %2244 = vmatpush3.bf16.msra.mxu1 %v2474_v47  ;;  %2205 = vmatprep.subr.bf16.mxu0 %v2475_v48 }
  0x68   : > { %2245 = vmatprep.subr.bf16.mxu1 %v2476_v49  ;;  %1486 = vmatprep.mubr.bf16.mxu0 %v2479_v52 }
  0x69   : > { %1551 = vmatprep.mubr.bf16.mxu1 %v2481_v53 }
  0x6a   : > { %2206 = vmatpush3.bf16.msra.mxu0 %v2477_v50 }
  0x6b   : > { %2246 = vmatpush3.bf16.msra.mxu1 %v2478_v51  ;;  %2207 = vmatprep.subr.bf16.mxu0 %v2485_v56 }
  0x6c   : > { %2247 = vmatprep.subr.bf16.mxu1 %v2486_v57 }
  0x6d   : > { %1487 = vmatmul.mubr.bf16.gmra.mxu0 %v2483_v54 }
  0x6e   : > { %1552 = vmatmul.mubr.bf16.gmra.mxu1 %v2484_v55  ;;  %2208 = vmatpush3.bf16.msra.mxu0 %v2487_v58 }
  0x6f   : > { %2248 = vmatpush3.bf16.msra.mxu1 %v2488_v59  ;;  %2209 = vmatprep.subr.bf16.mxu0 %v2489_v60 }
  0x70   : > { %2249 = vmatprep.subr.bf16.mxu1 %v2490_v61  ;;  %1592 = vmatprep.mubr.bf16.mxu0 %v2495_v1 }
  0x71   : > { %1657 = vmatprep.mubr.bf16.mxu1 %v2498_v3 }
  0x72   : > { %2210 = vmatpush3.bf16.msra.mxu0 %v2491_v62 }
  0x73   : > { %2250 = vmatpush3.bf16.msra.mxu1 %v2492_v63  ;;  %2283 = vmatprep.subr.bf16.mxu0 %v2499_v4 }
  0x74   : > { %2299 = vmatprep.subr.bf16.mxu1 %v2499_v4 }
  0x75   : > { %1593 = vmatmul.mubr.bf16.vlgmr.msra.gmra.mxu0 %v2493_v0 }
  0x76   : > { %1658 = vmatmul.mubr.bf16.vlgmr.msra.gmra.mxu1 %v2496_v2  ;;  %2284 = vmatpush3.bf16.msra.mxu0 %v2499_v4 }
  0x77   : > { %2303 = vmatpush3.bf16.msra.mxu1 %v2499_v4  ;;  %1600 = vmatprep.mubr.bf16.mxu0 %v2500_v5 }
  0x78   : > { %1665 = vmatprep.mubr.bf16.mxu1 %v2502_v6  ;;  %2285 = vmatprep.subr.bf16.mxu0 %v2506_v7 }
  0x79   : > { %2300 = vmatprep.subr.bf16.mxu1 %v2506_v7 }
  0x7a   : > { %2286 = vmatpush3.bf16.msra.mxu0 %v2506_v7 }
  0x7b   : > { %2304 = vmatpush3.bf16.msra.mxu1 %v2506_v7  ;;  %2287 = vmatprep.subr.bf16.mxu0 %v2513_v12 }
  0x7c   : > { %2301 = vmatprep.subr.bf16.mxu1 %v2513_v12 }
  0x7d   : > { %1601 = vmatmul.mubr.bf16.gmra.mxu0 %v2504_v8 }
  0x7e   : > { %1666 = vmatmul.mubr.bf16.gmra.mxu1 %v2505_v9  ;;  %1608 = vmatprep.mubr.bf16.mxu0 %v2507_v10 }
  0x7f   : > { %1673 = vmatprep.mubr.bf16.mxu1 %v2509_v11  ;;  %2288 = vmatpush3.bf16.msra.mxu0 %v2513_v12 }
  0x80   : > { %2305 = vmatpush3.bf16.msra.mxu1 %v2513_v12  ;;  %2289 = vmatprep.subr.bf16.mxu0 %v2520_v13 }
  0x81   : > { %2302 = vmatprep.subr.bf16.mxu1 %v2520_v13 }
  0x83   : > { %2290 = vmatpush3.bf16.msra.mxu0 %v2520_v13 }
  0x84   : > { %2306 = vmatpush3.bf16.msra.mxu1 %v2520_v13 }
  0x85   : > { %1609 = vmatmul.mubr.bf16.gmra.mxu0 %v2511_v14 }
  0x86   : > { %1674 = vmatmul.mubr.bf16.gmra.mxu1 %v2512_v15  ;;  %1616 = vmatprep.mubr.bf16.mxu0 %v2514_v16 }
  0x87   : > { %1681 = vmatprep.mubr.bf16.mxu1 %v2516_v17 }
  0x8d   : > { %1617 = vmatmul.mubr.bf16.gmra.mxu0 %v2518_v18 }
  0x8e   : > { %1682 = vmatmul.mubr.bf16.gmra.mxu1 %v2519_v19  ;;  %2291 = vmatprep.mubr.msk.bf16.mxu0 %vm1287_vm0, %v2521_v20 }
  0x8f   : > { %2295 = vmatprep.mubr.msk.bf16.mxu1 %vm1287_vm0, %v2522_v21 }
  0x95   : > { %2292 = vmatmul.mubr.msk.bf16.vlgmr.msra.gmra.mxu0 %vm1287_vm0, %v2523_v22 }
  0x96   : > { %2296 = vmatmul.mubr.msk.bf16.vlgmr.msra.gmra.mxu1 %vm1287_vm0, %v2524_v23 }
  0xf5   : > { %v2051_v24 = vpop.f32.mrf.mxu0 }
  0xf6   : > { %v2091_v25 = vpop.f32.mrf.mxu1 }
  0xf7   : > { %v2052_v26 = vpop.f32.mrf.mxu0 }
  0xf8   : > { %v2053_v27 = vadd.f32 %v2052_v26, %v2051_v24  ;;  %v2092_v28 = vpop.f32.mrf.mxu1 }
  0xf9   : > { %v2093_v29 = vadd.f32 %v2092_v28, %v2091_v25  ;;  %v2054_v30 = vpop.f32.mrf.mxu0 }
  0xfa   : > { %v2094_v31 = vpop.f32.mrf.mxu1 }
  0xfb   : > { %v3017_v32 = vadd.f32 %v2093_v29, %v2053_v27  ;;  %v2055_v33 = vpop.f32.mrf.mxu0 }
  0xfc   : > { %v2056_v34 = vadd.f32 %v2055_v33, %v2054_v30  ;;  %v2095_v35 = vpop.f32.mrf.mxu1 }
  0xfd   : > { %v2096_v36 = vadd.f32 %v2095_v35, %v2094_v31  ;;  %v2057_v38 = vpop.f32.mrf.mxu0 }
  0xfe   : > { %v2097_v39 = vpop.f32.mrf.mxu1 }
  0xff   : > { %v3019_v37 = vadd.f32 %v2096_v36, %v2056_v34  ;;  %v2058_v40 = vpop.f32.mrf.mxu0 }
 0x100   : > { %v2059_v41 = vadd.f32 %v2058_v40, %v2057_v38  ;;  %v2098_v42 = vpop.f32.mrf.mxu1 }
 0x101   : > { %v2099_v43 = vadd.f32 %v2098_v42, %v2097_v39  ;;  %v2060_v44 = vpop.f32.mrf.mxu0 }
 0x102   : > { %v2100_v45 = vpop.f32.mrf.mxu1 }
 0x103   : > { %v3021_v46 = vadd.f32 %v2099_v43, %v2059_v41  ;;  %v2061_v47 = vpop.f32.mrf.mxu0 }
 0x104   : > { %v2062_v48 = vadd.f32 %v2061_v47, %v2060_v44  ;;  %v2101_v49 = vpop.f32.mrf.mxu1 }
 0x105   : > { %v2102_v50 = vadd.f32 %v2101_v49, %v2100_v45  ;;  %v2063_v52 = vpop.f32.mrf.mxu0 }
 0x106   : > { %v2103_v53 = vpop.f32.mrf.mxu1 }
 0x107   : > { %v3023_v51 = vadd.f32 %v2102_v50, %v2062_v48  ;;  %v2064_v54 = vpop.f32.mrf.mxu0 }
 0x108   : > { %v2065_v55 = vadd.f32 %v2064_v54, %v2063_v52  ;;  %v2104_v56 = vpop.f32.mrf.mxu1 }
 0x109   : > { %v2105_v57 = vadd.f32 %v2104_v56, %v2103_v53  ;;  %v2066_v58 = vpop.f32.mrf.mxu0 }
 0x10a   : > { %v2106_v59 = vpop.f32.mrf.mxu1 }
 0x10b   : > { %v3025_v60 = vadd.f32 %v2105_v57, %v2065_v55  ;;  %v2067_v61 = vpop.f32.mrf.mxu0 }
 0x10c   : > { %v2068_v62 = vadd.f32 %v2067_v61, %v2066_v58  ;;  %v2107_v63 = vpop.f32.mrf.mxu1 }
 0x10d   : > { %v2108_v0 = vadd.f32 %v2107_v63, %v2106_v59  ;;  %v2069_v2 = vpop.f32.mrf.mxu0 }
 0x10e   : > { %v2109_v3 = vpop.f32.mrf.mxu1 }
 0x10f   : > { %v3027_v1 = vadd.f32 %v2108_v0, %v2068_v62  ;;  %v2070_v4 = vpop.f32.mrf.mxu0 }
 0x110   : > { %v2110_v5 = vpop.f32.mrf.mxu1  ;;  %v2071_v6 = vadd.f32 %v2070_v4, %v2069_v2 }
 0x111   : > { %v2111_v7 = vadd.f32 %v2110_v5, %v2109_v3  ;;  %v2072_v8 = vpop.f32.mrf.mxu0 }
 0x112   : > { %v2112_v9 = vpop.f32.mrf.mxu1 }
 0x113   : > { %v3029_v10 = vadd.f32 %v2111_v7, %v2071_v6  ;;  %v2073_v11 = vpop.f32.mrf.mxu0 }
 0x114   : > { %v2113_v12 = vpop.f32.mrf.mxu1  ;;  %v2074_v13 = vadd.f32 %v2073_v11, %v2072_v8 }
 0x115   : > { %v2114_v14 = vadd.f32 %v2113_v12, %v2112_v9  ;;  %v2131_v16 = vpop.f32.mrf.mxu0 }
 0x116   : > { %v3033_v17 = vpop.f32.mrf.mxu1 }
 0x117   : > { %v3031_v15 = vadd.f32 %v2114_v14, %v2074_v13  ;;  %v2132_v18 = vpop.f32.mrf.mxu0 }
 0x118   : > { %v2172_v19 = vpop.f32.mrf.mxu1  ;;  %v2133_v8 = vadd.f32 %v2132_v18, %v2131_v16 }
 0x119   : > { %v2134_v20 = vpop.f32.mrf.mxu0 }
 0x11a   : > { %v2174_v21 = vpop.f32.mrf.mxu1 }
 0x11b   : > { %v2135_v22 = vpop.f32.mrf.mxu0 }
 0x11c   : > { %v2175_v23 = vpop.f32.mrf.mxu1  ;;  %v2136_v9 = vadd.f32 %v2135_v22, %v2134_v20 }
 0x11d   : > { %v2137_v24 = vpop.f32.mrf.mxu0  ;;  %v2176_v16 = vadd.f32 %v2175_v23, %v2174_v21 }
 0x11e   : > { %v2177_v25 = vpop.f32.mrf.mxu1 }
 0x11f   : > { %v2138_v26 = vpop.f32.mrf.mxu0 }
 0x120   : > { %v2178_v27 = vpop.f32.mrf.mxu1  ;;  %v2139_v11 = vadd.f32 %v2138_v26, %v2137_v24 }
 0x121   : > { %v2140_v28 = vpop.f32.mrf.mxu0  ;;  %v2179_v22 = vadd.f32 %v2178_v27, %v2177_v25 }
 0x122   : > { %v2180_v29 = vpop.f32.mrf.mxu1 }
 0x123   : > { %v2141_v30 = vpop.f32.mrf.mxu0 }
 0x124   : > { %v2181_v31 = vpop.f32.mrf.mxu1  ;;  %v2142_v13 = vadd.f32 %v2141_v30, %v2140_v28 }
 0x125   : > { %v2143_v33 = vpop.f32.mrf.mxu0 }
 0x126   : > { %v3035_v34 = vpop.f32.mrf.mxu1  ;;  %v1476_v18 = vadd.f32 %v2142_v13, %v3023_v51 }
 0x127   : > { %v2144_v35 = vpop.f32.mrf.mxu0 }
 0x128   : > { %v3037_v36 = vpop.f32.mrf.mxu1 }
 0x129   : > { %v2146_v38 = vpop.f32.mrf.mxu0  ;;  %v2185_v51 = vadd.f32 %v3037_v36, %v3035_v34 }
 0x12a   : > { %v3039_v39 = vpop.f32.mrf.mxu1 }
 0x12b   : > { %v2147_v40 = vpop.f32.mrf.mxu0 }
 0x12c   : > { %v3041_v41 = vpop.f32.mrf.mxu1  ;;  %v2148_v24 = vadd.f32 %v2147_v40, %v2146_v38 }
 0x12d   : > { %v2149_v42 = vpop.f32.mrf.mxu0 }
 0x12e   : > { %v2189_v43 = vpop.f32.mrf.mxu1  ;;  %v1484_v27 = vadd.f32 %v2148_v24, %v3027_v1 }
 0x12f   : > { %v2150_v44 = vpop.f32.mrf.mxu0 }
 0x130   : > { %v2190_v45 = vpop.f32.mrf.mxu1 }
 0x131   : > { %v2152_v47 = vpop.f32.mrf.mxu0 }
 0x132   : > { %v3043_v48 = vpop.f32.mrf.mxu1 }
 0x133   : > { %v2153_v49 = vpop.f32.mrf.mxu0 }
 0x134   : > { %v3045_v50 = vpop.f32.mrf.mxu1  ;;  %v2154_v28 = vadd.f32 %v2153_v49, %v2152_v47 }
 0x135   : > { %3147 = vst [vmem:[#allocation6_spill] sm:$0xff] %v3045_v50  ;;  %v2211_v52 = vpop.f32.mrf.mxu0 }
 0x136   : > { %v3047_v53 = vpop.f32.mrf.mxu1 }
 0x137   : > { %3148 = vst [vmem:[#allocation7_spill] sm:$0xff] %v3047_v53  ;;  %v2212_v54 = vpop.f32.mrf.mxu0  ;;  %v1465_v53 = vadd.f32 %v2133_v8, %v3017_v32 }
 0x138   : > { %v3049_v55 = vpop.f32.mrf.mxu1 }
 0x139   : > { %3149 = vst [vmem:[#allocation8_spill] sm:$0xff] %v3049_v55  ;;  %v2214_v56 = vpop.f32.mrf.mxu0 }
 0x13a   : > { %v3051_v57 = vpop.f32.mrf.mxu1 }
 0x13b   : > { %3150 = vst [vmem:[#allocation9_spill] sm:$0xff] %v3051_v57  ;;  %v2215_v58 = vpop.f32.mrf.mxu0 }
 0x13c   : > { %v3053_v59 = vpop.f32.mrf.mxu1  ;;  %v3156_v34 = vld [vmem:[#allocation6_spill] sm:$0xff] }
 0x13d   : > { %3151 = vst [vmem:[#allocation10_spill] sm:$0xff] %v3053_v59  ;;  %v2217_v61 = vpop.f32.mrf.mxu0  ;;  %v2151_v59 = vadd.f32 %v2150_v44, %v2149_v42  ;;  %v2194_v36 = vadd.f32 %v3156_v34, %v3043_v48 }
 0x13e   : > { %v3055_v62 = vpop.f32.mrf.mxu1  ;;  %v3157_v1 = vld [vmem:[#allocation7_spill] sm:$0xff] }
 0x13f   : > { %3152 = vst [vmem:[#allocation11_spill] sm:$0xff] %v3055_v62  ;;  %v2218_v63 = vpop.f32.mrf.mxu0  ;;  %v2145_v62 = vadd.f32 %v2144_v35, %v2143_v33  ;;  %v1489_v26 = vadd.f32 %v2151_v59, %v3029_v10  ;;  %v2182_v33 = vadd.f32 %v2181_v31, %v2180_v29  ;;  %v2213_v35 = vadd.f32 %v2212_v54, %v2211_v52 }
 0x140   : > { %v2258_v0 = vpop.f32.mrf.mxu1  ;;  %v2216_v31 = vadd.f32 %v2215_v58, %v2214_v56 }
 0x141   : > { %v2220_v2 = vpop.f32.mrf.mxu0  ;;  %v1481_v32 = vadd.f32 %v2145_v62, %v3025_v60  ;;  %v1541_v21 = vadd.f32 %v2182_v33, %v1476_v18  ;;  %v1492_v60 = vadd.f32 %v2154_v28, %v3031_v15 }
 0x142   : > { %v3057_v3 = vpop.f32.mrf.mxu1 }
 0x143   : > { %3153 = vst [vmem:[#allocation12_spill] sm:$0xff] %v3057_v3  ;;  %v2221_v4 = vpop.f32.mrf.mxu0  ;;  %v1468_v3 = vadd.f32 %v2136_v9, %v3019_v37  ;;  %v2219_v37 = vadd.f32 %v2218_v63, %v2217_v61  ;;  %v1546_v40 = vadd.f32 %v2185_v51, %v1481_v32  ;;  %v3158_v61 = vld [vmem:[#allocation8_spill] sm:$0xff] }
 0x144   : > { %v3059_v5 = vpop.f32.mrf.mxu1  ;;  %v2222_v52 = vadd.f32 %v2221_v4, %v2220_v2  ;;  %v2253_v62 = vadd.f32 %v3158_v61, %v3157_v1  ;;  %v1557_v2 = vadd.f32 %v2194_v36, %v1492_v60 }
 0x145   : > { %3154 = vst [vmem:[#allocation13_spill] sm:$0xff] %v3059_v5  ;;  %v2223_v6 = vpop.f32.mrf.mxu0  ;;  %v1473_v5 = vadd.f32 %v2139_v11, %v3021_v46  ;;  %v1533_v44 = vadd.f32 %v2176_v16, %v1468_v3  ;;  %v3161_v11 = vld [vmem:[#allocation9_spill] sm:$0xff] }
 0x146   : > { %v3061_v7 = vpop.f32.mrf.mxu1  ;;  %v3159_v15 = vld [vmem:[#allocation11_spill] sm:$0xff] }
 0x147   : > { %3155 = vst [vmem:[#allocation14_spill] sm:$0xff] %v3061_v7  ;;  %v2224_v12 = vpop.f32.mrf.mxu0  ;;  %v2173_v7 = vadd.f32 %v2172_v19, %v3033_v17  ;;  %v1538_v8 = vadd.f32 %v2179_v22, %v1473_v5  ;;  %v2191_v17 = vadd.f32 %v2190_v45, %v2189_v43  ;;  %v2188_v45 = vadd.f32 %v3041_v41, %v3039_v39 }
 0x148   : > { %v2264_v14 = vpop.f32.mrf.mxu1  ;;  %v2225_v23 = vadd.f32 %v2224_v12, %v2223_v6  ;;  %v2259_v56 = vadd.f32 %v2258_v0, %v3159_v15  ;;  %v1598_v4 = vadd.f32 %v2216_v31, %v1533_v44  ;;  %v1606_v39 = vadd.f32 %v2222_v52, %v1541_v21  ;;  %v3162_v12 = vld [vmem:[#allocation10_spill] sm:$0xff] }
 0x149   : > { %v2226_v57 = vpop.f32.mrf.mxu0  ;;  %v1530_v46 = vadd.f32 %v2173_v7, %v1465_v53  ;;  %v1554_v29 = vadd.f32 %v2191_v17, %v1489_v26  ;;  %v1603_v49 = vadd.f32 %v2219_v37, %v1538_v8  ;;  %v1549_v5 = vadd.f32 %v2188_v45, %v1484_v27 }
 0x14a   : > { %v3063_v55 = vpop.f32.mrf.mxu1  ;;  %v1611_v58 = vadd.f32 %v2225_v23, %v1546_v40  ;;  %v2256_v13 = vadd.f32 %v3162_v12, %v3161_v11  ;;  %v3163_v16 = vld [vmem:[#allocation12_spill] sm:$0xff] }
 0x14b   : > { %v2227_v50 = vpop.f32.mrf.mxu0  ;;  %v1595_v47 = vadd.f32 %v2213_v35, %v1530_v46  ;;  %v1668_v48 = vadd.f32 %v2259_v56, %v1603_v49 }
 0x14c   : > { %v2267_v20 = vpop.f32.mrf.mxu1  ;;  %v2228_v53 = vadd.f32 %v2227_v50, %v2226_v57  ;;  %v3164_v18 = vld [vmem:[#allocation13_spill] sm:$0xff] }
 0x14d   : > { %v2229_v30 = vpop.f32.mrf.mxu0  ;;  %v1660_v57 = vadd.f32 %v2253_v62, %v1595_v47  ;;  %v2262_v0 = vadd.f32 %v3164_v18, %v3163_v16 }
 0x14e   : > { %v2269_v42 = vpop.f32.mrf.mxu1  ;;  %v3160_v41 = vld [vmem:[#allocation14_spill] sm:$0xff]  ;;  %v1614_v22 = vadd.f32 %v2228_v53, %v1549_v5 }
 0x14f   : > { %v2230_v19 = vpop.f32.mrf.mxu0  ;;  %v2265_v9 = vadd.f32 %v2264_v14, %v3160_v41  ;;  %v2268_v14 = vadd.f32 %v2267_v20, %v3063_v55  ;;  %v1671_v17 = vadd.f32 %v2262_v0, %v1606_v39  ;;  %v2028_v55 = vld [vmem:[%s3143_s2] ss:$0 sm:$0xff] }
 0x150   : > { %v2231_v25 = vadd.f32 %v2230_v19, %v2229_v30  ;;  %v2270_v10 = vpop.f32.mrf.mxu1 }
 0x151   : > { %v2232_v38 = vpop.f32.mrf.mxu0  ;;  %v2271_v6 = vadd.f32 %v2270_v10, %v2269_v42  ;;  %v1676_v32 = vadd.f32 %v2265_v9, %v1611_v58  ;;  %v1663_v42 = vadd.f32 %v2256_v13, %v1598_v4  ;;  %v1679_v23 = vadd.f32 %v2268_v14, %v1614_v22 }
 0x152   : > { %v2272_v43 = vpop.f32.mrf.mxu1  ;;  %v1619_v54 = vadd.f32 %v2231_v25, %v1554_v29 }
 0x153   : > { %v2233_v59 = vpop.f32.mrf.mxu0 }
 0x154   : > { %v2234_v63 = vadd.f32 %v2233_v59, %v2232_v38  ;;  %v2273_v3 = vpop.f32.mrf.mxu1  ;;  %v1684_v24 = vadd.f32 %v2271_v6, %v1619_v54 }
 0x155   : > { %v2293_v7 = vpop.f32.mrf.mxu0  ;;  %v2274_v46 = vadd.f32 %v2273_v3, %v2272_v43 }
 0x156   : > { %v2297_v50 = vpop.f32.mrf.mxu1  ;;  %v1622_v28 = vadd.f32 %v2234_v63, %v1557_v2  ;;  %v1733_v30 = vadd.f32 %v2293_v7, %v1668_v48 }
 0x157   : > { %v1724_v26 = vpop.f32.mrf.mxu0  ;;  %v1749_v21 = vadd.f32 %v2297_v50, %v1684_v24 }
 0x158   : > { %v1725_v33 = vadd.f32 %v1724_v26, %v1660_v57  ;;  %v1740_v35 = vpop.f32.mrf.mxu1  ;;  %v1687_v27 = vadd.f32 %v2274_v46, %v1622_v28 }
 0x159   : > { %v2294_v37 = vpop.f32.mrf.mxu0  ;;  %v1741_v8 = vadd.f32 %v1740_v35, %v1676_v32 }
 0x15a   : > { %v1767_v44 = vmax.f32 %v1725_v33, %v1733_v30  ;;  %v2298_v19 = vpop.f32.mrf.mxu1  ;;  %v1736_v10 = vadd.f32 %v2294_v37, %v1671_v17 }
 0x15b   : > { %v1727_v51 = vpop.f32.mrf.mxu0  ;;  %v1752_v47 = vadd.f32 %v2298_v19, %v1687_v27 }
 0x15c   : > { %v1771_v25 = vmax.f32 %v1767_v44, %v1741_v8  ;;  %v1728_v29 = vadd.f32 %v1727_v51, %v1663_v42  ;;  %v1743_v60 = vpop.f32.mrf.mxu1 }
 0x15d   : > { %v1744_v38 = vadd.f32 %v1743_v60, %v1679_v23 }
 0x15e   : > { %v1775_v20 = vmax.f32 %v1771_v25, %v1749_v21  ;;  %v1768_v31 = vmax.f32 %v1728_v29, %v1736_v10 }
 0x160   : > { %v1784_v40 = vadd.f32 %v2028_v55, %v1775_v20  ;;  %v1772_v49 = vmax.f32 %v1768_v31, %v1744_v38 }
 0x162   : > { %v1786_v52 = vmax.f32 %v1784_v40, 0.0  ;;  %v1776_v43 = vmax.f32 %v1772_v49, %v1752_v47 }
 0x164   : > { %1788 = vst [vmem:[%s163_s25] sm:$0xff] %v1786_v52  ;;  %v1785_v45 = vadd.f32 %v2028_v55, %v1776_v43 }
 0x166   : > { %v1787_v34 = vmax.f32 %v1785_v45, 0.0 }
 0x168   : > { %1789 = vst [vmem:[%s163_s25 + $0x8] sm:$0xff] %v1787_v34 }
 0x169   : > { %2538 = shalt.err (!%p2535_p3)
}
 0x16a   : > { %s2539_s8 = scalar_lea.hbm %s3097_s29, 256  ;;  %s2543_s11 = scalar_lea.hbm %s3144_s3, 512 }
 0x16b   : > { %p2540_p4 = scmp.ne.s32.totalorder %s3097_s29, %s2539_s8  ;;  %p2544_p9 = scmp.lt.s32.totalorder %s3097_s29, %s3144_s3 }
 0x16c   : > { %p2545_p10 = scmp.lt.s32.totalorder %s2543_s11, %s2539_s8 }
 0x16d   : > { %p2541_p7 = pnand %p2540_p4, %p2648_p5 }
 0x16e   : > { %p2546_p11 = por %p2545_p10, %p2544_p9 }
 0x16f   : > { %p2542_p8 = pneg %p2541_p7 }
 0x171   : > { %p2547_p12 = pnand %p2546_p11, %p2542_p8 }
 0x173   : > { %2550 = shalt.err (!%p2547_p12)
}
 0x174   : > { %s2588_s19 = smov 128   ;;  %s2589_s20 = smov 8  }
 0x175   : > { %2308 = dma.vmem_to_hbm [thread:$0]  (%p2648_p5), %s3099_s26, 256, %s3097_s29, %s3101_s30, %s2588_s19, %s2588_s19, %s2589_s20  }
 0x176 PF: > { %p2314_p13 = scmp.ge.s32.totalorder %s2585_s15, 2  ;;  %s1819_s24 = sand.u32 1, %s2573_s12  }
 0x177   : > { %s1820_s25 = scalar_lea.sflag [#allocation4], %s1819_s24 }
 0x178   : > { %p2311_p0 = pnand %p2314_p13, %p2652_p6 }
 0x17a   : > { %p2312_p1 = pneg %p2311_p0 }
 0x17c   : > { %2568 = dma.done.wait (%p2312_p1), %s1820_s25, 256  }
 0x17d   : > { %2570 = vsyncadd (%p2312_p1), %s1820_s25, 4294967040  ;;  %p13_p2 = scmp.ge.s32.totalorder %s2635_s18, 4   ;;  %s3165_s12 = smov %s2577_s13 }
 0x17e   : > { %s3166_s13 = smov %s2581_s14  ;;  %s3167_s14 = smov %s2646_s21 }
 0x17f   : > { %s3168_s15 = smov %s2635_s18  ;;  %15 = sbr.rel (!%p13_p2) target bundleno = 3 (0x3), region = 67 }
 0x184   :  { %1825 = vsyncpa [#allocation4], 1 }
 0x185   :  { %1827 = vsyncpa [#allocation4 + $0x1], 1 }

</bundles_post_ra>
